<compile_context>
chip_gen: v7x
topology: tpu7x:2x2x1
jax: 0.10.0
libtpu: 0.0.40
codegen_flags: <defaults>
</compile_context>

<pallas_src>
import functools

import jax
import jax.numpy as jnp
from jax.experimental import pallas as pl
from jax.experimental.pallas import tpu as pltpu


def _round_up(x, m):
    return (x + m - 1) // m * m


# ----------------------------------------------------------------------------
# Fused Pallas kernel: n_layers LSTM layers + tanh + linear head
# ----------------------------------------------------------------------------
def _make_fused_kernel(n_layers, T, Bp, H):
    """Builds the fused kernel body.

    Ref layout (inputs, then output, then scratch):
      x_ref                     : (T*Bp, Din0)    time-major, batch padded to Bp
      per layer l (3 refs each) :
        w_ih_ref                : (Din_l, 4H)     fused input->gate weight (i|f|g|o lanes)
        w_hh_ref                : (H, 4H)         fused hidden->gate weight (i|f|g|o lanes)
        b_ref                   : (1, 4H)         combined bias (b_ih + b_hh)
      w_lin_ref                 : (H, Fp)         head weight, lane-padded to Fp
      out_ref                   : (T*Bp, Fp)
      gx_ref   (scratch)        : (T*Bp, 4H)      hoisted input projections (lane-dense)
      hseq_ref (scratch)        : (T*Bp, H)       current layer's hidden sequence
    """

    def kernel(*refs):
        x_ref = refs[0]
        layer_refs = refs[1:1 + 3 * n_layers]
        w_lin_ref = refs[1 + 3 * n_layers]
        out_ref = refs[2 + 3 * n_layers]
        gx_ref = refs[3 + 3 * n_layers]
        hseq_ref = refs[4 + 3 * n_layers]

        # Lane-index mask selecting the g-gate (tanh) lanes [2H, 3H) of the
        # fused i|f|g|o pre-activation.  Hoisted once (JAX does not CSE
        # broadcast_in_dim), reused for every layer and time step.
        lane = jax.lax.broadcasted_iota(jnp.int32, (Bp, 4 * H), 1)
        g_mask = jnp.logical_and(lane >= 2 * H, lane < 3 * H)

        for l in range(n_layers):
            w_ih_ref = layer_refs[3 * l + 0]
            w_hh_ref = layer_refs[3 * l + 1]
            b_ref = layer_refs[3 * l + 2]
            last_layer = (l == n_layers - 1)

            # Layer input: original x for layer 0, previous layer's hidden
            # sequence (VMEM resident) afterwards.  Loaded before any write
            # to hseq_ref in this layer's time loop (ref ops keep program order).
            xin = x_ref[...] if l == 0 else hseq_ref[...]           # (N, Din_l)

            # ---- hoisted input->gate projection: ONE matmul, lane-dense ----
            gx_ref[...] = (
                jnp.dot(xin, w_ih_ref[...], preferred_element_type=jnp.float32)
                + b_ref[...]
            )                                                        # (N, 4H)

            # Fused recurrent weight, loaded once per layer, reused every step.
            w_hh = w_hh_ref[...]                                     # (H, 4H)
            # TODO(synk): optionally pin w_hh in MXU weight registers across the
            # time loop via pltpu.matmul_push_rhs / matmul_acc_lhs / matmul_pop.

            # ---- time recurrence (statically unrolled; T is small) ----
            h = jnp.zeros((Bp, H), jnp.float32)
            c = jnp.zeros((Bp, H), jnp.float32)
            for t in range(T):
                r0, r1 = t * Bp, (t + 1) * Bp                        # 8-aligned rows
                # One lane-full (8,32)@(32,128) MXU push per step + dense vld.
                pre = gx_ref[r0:r1, :] + jnp.dot(
                    h, w_hh, preferred_element_type=jnp.float32)     # (Bp, 4H)
                # One full-vreg sigmoid + one full-vreg tanh, blended by lane mask.
                act = jnp.where(g_mask, jnp.tanh(pre), jax.nn.sigmoid(pre))
                i_t = act[:, 0 * H:1 * H]
                f_t = act[:, 1 * H:2 * H]
                g_t = act[:, 2 * H:3 * H]
                o_t = act[:, 3 * H:4 * H]
                c = f_t * c + i_t * g_t
                h = o_t * jnp.tanh(c)
                # For the last layer fold the head activation into the store,
                # so the head below is a plain matmul (no bulk tanh pass).
                hseq_ref[r0:r1, :] = jnp.tanh(h) if last_layer else h

        # ---- head: out = tanh(h_seq) @ W_lin, lane-dense (N, Fp) store ----
        out_ref[...] = jnp.dot(
            hseq_ref[...], w_lin_ref[...], preferred_element_type=jnp.float32)

    return kernel


# ----------------------------------------------------------------------------
# Wrapper: full LSTMRegressor.forward
# ----------------------------------------------------------------------------
def lstm_regressor_forward(params, input_path):
    """input_path: (B, T, input_dim) float32 -> (B, T, D, D) complex64."""
    B, T, Din0 = input_path.shape
    D = params["output_dim"]
    layers = params["lstm_layers"]
    n_layers = len(layers)
    H = layers[0]["w_hh"].shape[1]
    F = 2 * D * D

    Bp = _round_up(max(B, 8), 8)        # fill vreg sublanes; keeps slices 8-aligned
    Fp = _round_up(max(F, 128), 128)    # lane-dense head output stores
    N = T * Bp

    # ---- wrapper-side layout prep (tiny XLA ops; weight prep folds under jit) ----
    x = jnp.transpose(input_path.astype(jnp.float32), (1, 0, 2))    # (T, B, Din)
    x = jnp.pad(x, ((0, 0), (0, Bp - B), (0, 0)))                   # (T, Bp, Din)
    x_flat = x.reshape(N, Din0)

    kernel_inputs = [x_flat]
    for layer in layers:
        # PyTorch layout: w_ih (4H, Din), w_hh (4H, H), gates i|f|g|o along 4H.
        # Transposing keeps the i|f|g|o order along the 4H lane axis.
        kernel_inputs.append(jnp.transpose(layer["w_ih"]))           # (Din, 4H)
        kernel_inputs.append(jnp.transpose(layer["w_hh"]))           # (H, 4H)
        kernel_inputs.append(
            (layer["b_ih"] + layer["b_hh"]).reshape(1, 4 * H))       # (1, 4H)
    w_lin_t = jnp.transpose(params["w_lin"])                         # (H, F)
    kernel_inputs.append(jnp.pad(w_lin_t, ((0, 0), (0, Fp - F))))    # (H, Fp)

    out = pl.pallas_call(
        _make_fused_kernel(n_layers, T, Bp, H),
        out_shape=jax.ShapeDtypeStruct((N, Fp), jnp.float32),
        in_specs=[pl.BlockSpec(memory_space=pltpu.MemorySpace.VMEM)]
        * len(kernel_inputs),
        out_specs=pl.BlockSpec(memory_space=pltpu.MemorySpace.VMEM),
        scratch_shapes=[
            pltpu.VMEM((N, 4 * H), jnp.float32),  # gx: hoisted gate pre-activations
            pltpu.VMEM((N, H), jnp.float32),      # hseq: per-layer hidden sequence
        ],
    )(*kernel_inputs)

    y = out.reshape(T, Bp, Fp)[:, :B, :F]                            # drop padding
    y = jnp.transpose(y, (1, 0, 2))                                  # (B, T, F)
    X = y.reshape(B, T, 2, D, D)
    return X[:, :, 0] + 1j * X[:, :, 1]                              # complex64


# ----------------------------------------------------------------------------
# Deterministic parameter init (synthetic; mirrors the nn.Module shapes)
# ----------------------------------------------------------------------------
def init_params(key, input_dim, output_dim, hidden_dim, n_layers):
    layers = []
    for l in range(n_layers):
        din = input_dim if l == 0 else hidden_dim
        key, k1, k2, k3, k4 = jax.random.split(key, 5)
        layers.append(dict(
            w_ih=0.1 * jax.random.normal(k1, (4 * hidden_dim, din), jnp.float32),
            w_hh=0.1 * jax.random.normal(k2, (4 * hidden_dim, hidden_dim), jnp.float32),
            b_ih=0.1 * jax.random.normal(k3, (4 * hidden_dim,), jnp.float32),
            b_hh=0.1 * jax.random.normal(k4, (4 * hidden_dim,), jnp.float32),
        ))
    key, k5 = jax.random.split(key)
    w_lin = 0.1 * jax.random.normal(k5, (2 * output_dim**2, hidden_dim), jnp.float32)
    return dict(lstm_layers=layers, w_lin=w_lin, output_dim=output_dim)


# ----------------------------------------------------------------------------
# Pure-JAX reference (for correctness check of the Pallas kernel)
# ----------------------------------------------------------------------------
def reference_forward(params, input_path):
    B, T, _ = input_path.shape
    D = params["output_dim"]
    x = input_path.astype(jnp.float32)
    for layer in params["lstm_layers"]:
        H = layer["w_hh"].shape[1]
        w_ih_t = layer["w_ih"].T
        w_hh_t = layer["w_hh"].T
        bias = (layer["b_ih"] + layer["b_hh"]).reshape(1, -1)

        def step(carry, x_t, w_ih_t=w_ih_t, w_hh_t=w_hh_t, bias=bias, H=H):
            h, c = carry
            gates = x_t @ w_ih_t + h @ w_hh_t + bias
            i = jax.nn.sigmoid(gates[:, 0 * H:1 * H])
            f = jax.nn.sigmoid(gates[:, 1 * H:2 * H])
            g = jnp.tanh(gates[:, 2 * H:3 * H])
            o = jax.nn.sigmoid(gates[:, 3 * H:4 * H])
            c = f * c + i * g
            h = o * jnp.tanh(c)
            return (h, c), h

        init = (jnp.zeros((B, H), jnp.float32), jnp.zeros((B, H), jnp.float32))
        _, hs = jax.lax.scan(step, init, jnp.transpose(x, (1, 0, 2)))
        x = jnp.transpose(hs, (1, 0, 2))
    y = jnp.tanh(x) @ params["w_lin"].T
    X = y.reshape(B, T, 2, D, D)
    return X[:, :, 0] + 1j * X[:, :, 1]


# ----------------------------------------------------------------------------
if __name__ == "__main__":
    INPUT_DIM, OUTPUT_DIM, HIDDEN_DIM, N_LAYERS = 3, 4, 32, 2
    B, T = 2, 8

    key = jax.random.PRNGKey(0)
    kp, kx = jax.random.split(key)
    params = init_params(kp, INPUT_DIM, OUTPUT_DIM, HIDDEN_DIM, N_LAYERS)
    input_path = jax.random.normal(kx, (B, T, INPUT_DIM), jnp.float32)

    fwd = jax.jit(functools.partial(lstm_regressor_forward, params))
    out = jax.block_until_ready(fwd(input_path))

    assert out.shape == (B, T, OUTPUT_DIM, OUTPUT_DIM), out.shape
    assert out.dtype == jnp.complex64, out.dtype

    ref = reference_forward(params, input_path)
    if not jnp.allclose(out, ref, atol=1e-5, rtol=1e-5):
        err = jnp.max(jnp.abs(out - ref))
        raise AssertionError(f"Pallas result does not match JAX reference (max |err|={err})")

    print("KERNEL_OK")
</pallas_src>

<mosaic_0001>
module attributes {stable_mosaic.version = 11 : i64} {
  func.func @kernel(%arg0: memref<64x3xf32, #tpu.memory_space<vmem>>, %arg1: memref<3x128xf32, #tpu.memory_space<vmem>>, %arg2: memref<32x128xf32, #tpu.memory_space<vmem>>, %arg3: memref<1x128xf32, #tpu.memory_space<vmem>>, %arg4: memref<32x128xf32, #tpu.memory_space<vmem>>, %arg5: memref<32x128xf32, #tpu.memory_space<vmem>>, %arg6: memref<1x128xf32, #tpu.memory_space<vmem>>, %arg7: memref<32x128xf32, #tpu.memory_space<vmem>>, %arg8: memref<64x128xf32, #tpu.memory_space<vmem>>, %arg9: memref<64x128xf32, #tpu.memory_space<vmem>>, %arg10: memref<64x32xf32, #tpu.memory_space<vmem>>) attributes {dimension_semantics = [], scalar_prefetch = 0 : i64, scratch_operands = 2 : i64, tpu.core_type = #tpu.core_type<tc>} {
    %0 = tpu.iota {dimensions = array<i32: 1>} : vector<8x128xi32>
    %c64_i32 = arith.constant 64 : i32
    %1 = vector.broadcast %c64_i32 : i32 to vector<8x128xi32>
    %2 = arith.cmpi sge, %0, %1 : vector<8x128xi32>
    %c96_i32 = arith.constant 96 : i32
    %3 = vector.broadcast %c96_i32 : i32 to vector<8x128xi32>
    %4 = arith.cmpi slt, %0, %3 : vector<8x128xi32>
    %5 = arith.andi %2, %4 : vector<8x128xi1>
    %c0 = arith.constant 0 : index
    %c0_0 = arith.constant 0 : index
    %6 = vector.load %arg0[%c0, %c0_0] : memref<64x3xf32, #tpu.memory_space<vmem>>, vector<64x3xf32>
    %c0_1 = arith.constant 0 : index
    %c0_2 = arith.constant 0 : index
    %7 = vector.load %arg1[%c0_1, %c0_2] : memref<3x128xf32, #tpu.memory_space<vmem>>, vector<3x128xf32>
    %cst = arith.constant dense<0.000000e+00> : vector<64x128xf32>
    %8 = tpu.matmul %6, %7, %cst {dimension_numbers = #tpu.dot_dimension_numbers<[1], [0], [0], [1], [0, 0, 1, 1], [], []>} : vector<64x3xf32>, vector<3x128xf32>, vector<64x128xf32> -> vector<64x128xf32>
    %c0_3 = arith.constant 0 : index
    %c0_4 = arith.constant 0 : index
    %9 = vector.load %arg3[%c0_3, %c0_4] : memref<1x128xf32, #tpu.memory_space<vmem>>, vector<1x128xf32>
    %10 = vector.broadcast %9 : vector<1x128xf32> to vector<64x128xf32>
    %11 = arith.addf %8, %10 : vector<64x128xf32>
    %c0_5 = arith.constant 0 : index
    %c0_6 = arith.constant 0 : index
    %12 = vector.load %arg9[%c0_5, %c0_6] : memref<64x128xf32, #tpu.memory_space<vmem>>, vector<64x128xf32>
    tpu.vector_store %arg9[%c0_5, %c0_6], %11 {strides = array<i32>} : memref<64x128xf32, #tpu.memory_space<vmem>>, vector<64x128xf32>,
    %c0_7 = arith.constant 0 : index
    %c0_8 = arith.constant 0 : index
    %13 = vector.load %arg2[%c0_7, %c0_8] : memref<32x128xf32, #tpu.memory_space<vmem>>, vector<32x128xf32>
    %cst_9 = arith.constant 0.000000e+00 : f32
    %14 = vector.broadcast %cst_9 : f32 to vector<8x32xf32>
    %cst_10 = arith.constant 0.000000e+00 : f32
    %15 = vector.broadcast %cst_10 : f32 to vector<8x32xf32>
    %c0_11 = arith.constant 0 : index
    %c0_12 = arith.constant 0 : index
    %16 = vector.load %arg9[%c0_11, %c0_12] : memref<64x128xf32, #tpu.memory_space<vmem>>, vector<8x128xf32>
    %cst_13 = arith.constant dense<0.000000e+00> : vector<8x128xf32>
    %17 = tpu.matmul %14, %13, %cst_13 {dimension_numbers = #tpu.dot_dimension_numbers<[1], [0], [0], [1], [0, 0, 1, 1], [], []>} : vector<8x32xf32>, vector<32x128xf32>, vector<8x128xf32> -> vector<8x128xf32>
    %18 = arith.addf %16, %17 : vector<8x128xf32>
    %19 = math.tanh %18 : vector<8x128xf32>
    %20 = arith.negf %18 : vector<8x128xf32>
    %21 = math.exp %20 : vector<8x128xf32>
    %cst_14 = arith.constant 1.000000e+00 : f32
    %22 = vector.broadcast %cst_14 : f32 to vector<8x128xf32>
    %23 = arith.addf %22, %21 : vector<8x128xf32>
    %24 = arith.divf %22, %23 : vector<8x128xf32>
    %25 = arith.select %5, %19, %24 : vector<8x128xi1>, vector<8x128xf32>
    %26 = vector.extract_strided_slice %25 {offsets = [0, 0], sizes = [8, 32], strides = [1, 1]} : vector<8x128xf32> to vector<8x32xf32>
    %27 = vector.extract_strided_slice %25 {offsets = [0, 32], sizes = [8, 32], strides = [1, 1]} : vector<8x128xf32> to vector<8x32xf32>
    %28 = vector.extract_strided_slice %25 {offsets = [0, 64], sizes = [8, 32], strides = [1, 1]} : vector<8x128xf32> to vector<8x32xf32>
    %29 = vector.extract_strided_slice %25 {offsets = [0, 96], sizes = [8, 32], strides = [1, 1]} : vector<8x128xf32> to vector<8x32xf32>
    %30 = arith.mulf %27, %15 : vector<8x32xf32>
    %31 = arith.mulf %26, %28 : vector<8x32xf32>
    %32 = arith.addf %30, %31 : vector<8x32xf32>
    %33 = math.tanh %32 : vector<8x32xf32>
    %34 = arith.mulf %29, %33 : vector<8x32xf32>
    %c0_15 = arith.constant 0 : index
    %c0_16 = arith.constant 0 : index
    %35 = vector.load %arg10[%c0_15, %c0_16] : memref<64x32xf32, #tpu.memory_space<vmem>>, vector<8x32xf32>
    tpu.vector_store %arg10[%c0_15, %c0_16], %34 {strides = array<i32>} : memref<64x32xf32, #tpu.memory_space<vmem>>, vector<8x32xf32>,
    %c8 = arith.constant 8 : index
    %c0_17 = arith.constant 0 : index
    %36 = vector.load %arg9[%c8, %c0_17] : memref<64x128xf32, #tpu.memory_space<vmem>>, vector<8x128xf32>
    %cst_18 = arith.constant dense<0.000000e+00> : vector<8x128xf32>
    %37 = tpu.matmul %34, %13, %cst_18 {dimension_numbers = #tpu.dot_dimension_numbers<[1], [0], [0], [1], [0, 0, 1, 1], [], []>} : vector<8x32xf32>, vector<32x128xf32>, vector<8x128xf32> -> vector<8x128xf32>
    %38 = arith.addf %36, %37 : vector<8x128xf32>
    %39 = math.tanh %38 : vector<8x128xf32>
    %40 = arith.negf %38 : vector<8x128xf32>
    %41 = math.exp %40 : vector<8x128xf32>
    %cst_19 = arith.constant 1.000000e+00 : f32
    %42 = vector.broadcast %cst_19 : f32 to vector<8x128xf32>
    %43 = arith.addf %42, %41 : vector<8x128xf32>
    %44 = arith.divf %42, %43 : vector<8x128xf32>
    %45 = arith.select %5, %39, %44 : vector<8x128xi1>, vector<8x128xf32>
    %46 = vector.extract_strided_slice %45 {offsets = [0, 0], sizes = [8, 32], strides = [1, 1]} : vector<8x128xf32> to vector<8x32xf32>
    %47 = vector.extract_strided_slice %45 {offsets = [0, 32], sizes = [8, 32], strides = [1, 1]} : vector<8x128xf32> to vector<8x32xf32>
    %48 = vector.extract_strided_slice %45 {offsets = [0, 64], sizes = [8, 32], strides = [1, 1]} : vector<8x128xf32> to vector<8x32xf32>
    %49 = vector.extract_strided_slice %45 {offsets = [0, 96], sizes = [8, 32], strides = [1, 1]} : vector<8x128xf32> to vector<8x32xf32>
    %50 = arith.mulf %47, %32 : vector<8x32xf32>
    %51 = arith.mulf %46, %48 : vector<8x32xf32>
    %52 = arith.addf %50, %51 : vector<8x32xf32>
    %53 = math.tanh %52 : vector<8x32xf32>
    %54 = arith.mulf %49, %53 : vector<8x32xf32>
    %c8_20 = arith.constant 8 : index
    %c0_21 = arith.constant 0 : index
    %55 = vector.load %arg10[%c8_20, %c0_21] : memref<64x32xf32, #tpu.memory_space<vmem>>, vector<8x32xf32>
    tpu.vector_store %arg10[%c8_20, %c0_21], %54 {strides = array<i32>} : memref<64x32xf32, #tpu.memory_space<vmem>>, vector<8x32xf32>,
    %c16 = arith.constant 16 : index
    %c0_22 = arith.constant 0 : index
    %56 = vector.load %arg9[%c16, %c0_22] : memref<64x128xf32, #tpu.memory_space<vmem>>, vector<8x128xf32>
    %cst_23 = arith.constant dense<0.000000e+00> : vector<8x128xf32>
    %57 = tpu.matmul %54, %13, %cst_23 {dimension_numbers = #tpu.dot_dimension_numbers<[1], [0], [0], [1], [0, 0, 1, 1], [], []>} : vector<8x32xf32>, vector<32x128xf32>, vector<8x128xf32> -> vector<8x128xf32>
    %58 = arith.addf %56, %57 : vector<8x128xf32>
    %59 = math.tanh %58 : vector<8x128xf32>
    %60 = arith.negf %58 : vector<8x128xf32>
    %61 = math.exp %60 : vector<8x128xf32>
    %cst_24 = arith.constant 1.000000e+00 : f32
    %62 = vector.broadcast %cst_24 : f32 to vector<8x128xf32>
    %63 = arith.addf %62, %61 : vector<8x128xf32>
    %64 = arith.divf %62, %63 : vector<8x128xf32>
    %65 = arith.select %5, %59, %64 : vector<8x128xi1>, vector<8x128xf32>
    %66 = vector.extract_strided_slice %65 {offsets = [0, 0], sizes = [8, 32], strides = [1, 1]} : vector<8x128xf32> to vector<8x32xf32>
    %67 = vector.extract_strided_slice %65 {offsets = [0, 32], sizes = [8, 32], strides = [1, 1]} : vector<8x128xf32> to vector<8x32xf32>
    %68 = vector.extract_strided_slice %65 {offsets = [0, 64], sizes = [8, 32], strides = [1, 1]} : vector<8x128xf32> to vector<8x32xf32>
    %69 = vector.extract_strided_slice %65 {offsets = [0, 96], sizes = [8, 32], strides = [1, 1]} : vector<8x128xf32> to vector<8x32xf32>
    %70 = arith.mulf %67, %52 : vector<8x32xf32>
    %71 = arith.mulf %66, %68 : vector<8x32xf32>
    %72 = arith.addf %70, %71 : vector<8x32xf32>
    %73 = math.tanh %72 : vector<8x32xf32>
    %74 = arith.mulf %69, %73 : vector<8x32xf32>
    %c16_25 = arith.constant 16 : index
    %c0_26 = arith.constant 0 : index
    %75 = vector.load %arg10[%c16_25, %c0_26] : memref<64x32xf32, #tpu.memory_space<vmem>>, vector<8x32xf32>
    tpu.vector_store %arg10[%c16_25, %c0_26], %74 {strides = array<i32>} : memref<64x32xf32, #tpu.memory_space<vmem>>, vector<8x32xf32>,
    %c24 = arith.constant 24 : index
    %c0_27 = arith.constant 0 : index
    %76 = vector.load %arg9[%c24, %c0_27] : memref<64x128xf32, #tpu.memory_space<vmem>>, vector<8x128xf32>
    %cst_28 = arith.constant dense<0.000000e+00> : vector<8x128xf32>
    %77 = tpu.matmul %74, %13, %cst_28 {dimension_numbers = #tpu.dot_dimension_numbers<[1], [0], [0], [1], [0, 0, 1, 1], [], []>} : vector<8x32xf32>, vector<32x128xf32>, vector<8x128xf32> -> vector<8x128xf32>
    %78 = arith.addf %76, %77 : vector<8x128xf32>
    %79 = math.tanh %78 : vector<8x128xf32>
    %80 = arith.negf %78 : vector<8x128xf32>
    %81 = math.exp %80 : vector<8x128xf32>
    %cst_29 = arith.constant 1.000000e+00 : f32
    %82 = vector.broadcast %cst_29 : f32 to vector<8x128xf32>
    %83 = arith.addf %82, %81 : vector<8x128xf32>
    %84 = arith.divf %82, %83 : vector<8x128xf32>
    %85 = arith.select %5, %79, %84 : vector<8x128xi1>, vector<8x128xf32>
    %86 = vector.extract_strided_slice %85 {offsets = [0, 0], sizes = [8, 32], strides = [1, 1]} : vector<8x128xf32> to vector<8x32xf32>
    %87 = vector.extract_strided_slice %85 {offsets = [0, 32], sizes = [8, 32], strides = [1, 1]} : vector<8x128xf32> to vector<8x32xf32>
    %88 = vector.extract_strided_slice %85 {offsets = [0, 64], sizes = [8, 32], strides = [1, 1]} : vector<8x128xf32> to vector<8x32xf32>
    %89 = vector.extract_strided_slice %85 {offsets = [0, 96], sizes = [8, 32], strides = [1, 1]} : vector<8x128xf32> to vector<8x32xf32>
    %90 = arith.mulf %87, %72 : vector<8x32xf32>
    %91 = arith.mulf %86, %88 : vector<8x32xf32>
    %92 = arith.addf %90, %91 : vector<8x32xf32>
    %93 = math.tanh %92 : vector<8x32xf32>
    %94 = arith.mulf %89, %93 : vector<8x32xf32>
    %c24_30 = arith.constant 24 : index
    %c0_31 = arith.constant 0 : index
    %95 = vector.load %arg10[%c24_30, %c0_31] : memref<64x32xf32, #tpu.memory_space<vmem>>, vector<8x32xf32>
    tpu.vector_store %arg10[%c24_30, %c0_31], %94 {strides = array<i32>} : memref<64x32xf32, #tpu.memory_space<vmem>>, vector<8x32xf32>,
    %c32 = arith.constant 32 : index
    %c0_32 = arith.constant 0 : index
    %96 = vector.load %arg9[%c32, %c0_32] : memref<64x128xf32, #tpu.memory_space<vmem>>, vector<8x128xf32>
    %cst_33 = arith.constant dense<0.000000e+00> : vector<8x128xf32>
    %97 = tpu.matmul %94, %13, %cst_33 {dimension_numbers = #tpu.dot_dimension_numbers<[1], [0], [0], [1], [0, 0, 1, 1], [], []>} : vector<8x32xf32>, vector<32x128xf32>, vector<8x128xf32> -> vector<8x128xf32>
    %98 = arith.addf %96, %97 : vector<8x128xf32>
    %99 = math.tanh %98 : vector<8x128xf32>
    %100 = arith.negf %98 : vector<8x128xf32>
    %101 = math.exp %100 : vector<8x128xf32>
    %cst_34 = arith.constant 1.000000e+00 : f32
    %102 = vector.broadcast %cst_34 : f32 to vector<8x128xf32>
    %103 = arith.addf %102, %101 : vector<8x128xf32>
    %104 = arith.divf %102, %103 : vector<8x128xf32>
    %105 = arith.select %5, %99, %104 : vector<8x128xi1>, vector<8x128xf32>
    %106 = vector.extract_strided_slice %105 {offsets = [0, 0], sizes = [8, 32], strides = [1, 1]} : vector<8x128xf32> to vector<8x32xf32>
    %107 = vector.extract_strided_slice %105 {offsets = [0, 32], sizes = [8, 32], strides = [1, 1]} : vector<8x128xf32> to vector<8x32xf32>
    %108 = vector.extract_strided_slice %105 {offsets = [0, 64], sizes = [8, 32], strides = [1, 1]} : vector<8x128xf32> to vector<8x32xf32>
    %109 = vector.extract_strided_slice %105 {offsets = [0, 96], sizes = [8, 32], strides = [1, 1]} : vector<8x128xf32> to vector<8x32xf32>
    %110 = arith.mulf %107, %92 : vector<8x32xf32>
    %111 = arith.mulf %106, %108 : vector<8x32xf32>
    %112 = arith.addf %110, %111 : vector<8x32xf32>
    %113 = math.tanh %112 : vector<8x32xf32>
    %114 = arith.mulf %109, %113 : vector<8x32xf32>
    %c32_35 = arith.constant 32 : index
    %c0_36 = arith.constant 0 : index
    %115 = vector.load %arg10[%c32_35, %c0_36] : memref<64x32xf32, #tpu.memory_space<vmem>>, vector<8x32xf32>
    tpu.vector_store %arg10[%c32_35, %c0_36], %114 {strides = array<i32>} : memref<64x32xf32, #tpu.memory_space<vmem>>, vector<8x32xf32>,
    %c40 = arith.constant 40 : index
    %c0_37 = arith.constant 0 : index
    %116 = vector.load %arg9[%c40, %c0_37] : memref<64x128xf32, #tpu.memory_space<vmem>>, vector<8x128xf32>
    %cst_38 = arith.constant dense<0.000000e+00> : vector<8x128xf32>
    %117 = tpu.matmul %114, %13, %cst_38 {dimension_numbers = #tpu.dot_dimension_numbers<[1], [0], [0], [1], [0, 0, 1, 1], [], []>} : vector<8x32xf32>, vector<32x128xf32>, vector<8x128xf32> -> vector<8x128xf32>
    %118 = arith.addf %116, %117 : vector<8x128xf32>
    %119 = math.tanh %118 : vector<8x128xf32>
    %120 = arith.negf %118 : vector<8x128xf32>
    %121 = math.exp %120 : vector<8x128xf32>
    %cst_39 = arith.constant 1.000000e+00 : f32
    %122 = vector.broadcast %cst_39 : f32 to vector<8x128xf32>
    %123 = arith.addf %122, %121 : vector<8x128xf32>
    %124 = arith.divf %122, %123 : vector<8x128xf32>
    %125 = arith.select %5, %119, %124 : vector<8x128xi1>, vector<8x128xf32>
    %126 = vector.extract_strided_slice %125 {offsets = [0, 0], sizes = [8, 32], strides = [1, 1]} : vector<8x128xf32> to vector<8x32xf32>
    %127 = vector.extract_strided_slice %125 {offsets = [0, 32], sizes = [8, 32], strides = [1, 1]} : vector<8x128xf32> to vector<8x32xf32>
    %128 = vector.extract_strided_slice %125 {offsets = [0, 64], sizes = [8, 32], strides = [1, 1]} : vector<8x128xf32> to vector<8x32xf32>
    %129 = vector.extract_strided_slice %125 {offsets = [0, 96], sizes = [8, 32], strides = [1, 1]} : vector<8x128xf32> to vector<8x32xf32>
    %130 = arith.mulf %127, %112 : vector<8x32xf32>
    %131 = arith.mulf %126, %128 : vector<8x32xf32>
    %132 = arith.addf %130, %131 : vector<8x32xf32>
    %133 = math.tanh %132 : vector<8x32xf32>
    %134 = arith.mulf %129, %133 : vector<8x32xf32>
    %c40_40 = arith.constant 40 : index
    %c0_41 = arith.constant 0 : index
    %135 = vector.load %arg10[%c40_40, %c0_41] : memref<64x32xf32, #tpu.memory_space<vmem>>, vector<8x32xf32>
    tpu.vector_store %arg10[%c40_40, %c0_41], %134 {strides = array<i32>} : memref<64x32xf32, #tpu.memory_space<vmem>>, vector<8x32xf32>,
    %c48 = arith.constant 48 : index
    %c0_42 = arith.constant 0 : index
    %136 = vector.load %arg9[%c48, %c0_42] : memref<64x128xf32, #tpu.memory_space<vmem>>, vector<8x128xf32>
    %cst_43 = arith.constant dense<0.000000e+00> : vector<8x128xf32>
    %137 = tpu.matmul %134, %13, %cst_43 {dimension_numbers = #tpu.dot_dimension_numbers<[1], [0], [0], [1], [0, 0, 1, 1], [], []>} : vector<8x32xf32>, vector<32x128xf32>, vector<8x128xf32> -> vector<8x128xf32>
    %138 = arith.addf %136, %137 : vector<8x128xf32>
    %139 = math.tanh %138 : vector<8x128xf32>
    %140 = arith.negf %138 : vector<8x128xf32>
    %141 = math.exp %140 : vector<8x128xf32>
    %cst_44 = arith.constant 1.000000e+00 : f32
    %142 = vector.broadcast %cst_44 : f32 to vector<8x128xf32>
    %143 = arith.addf %142, %141 : vector<8x128xf32>
    %144 = arith.divf %142, %143 : vector<8x128xf32>
    %145 = arith.select %5, %139, %144 : vector<8x128xi1>, vector<8x128xf32>
    %146 = vector.extract_strided_slice %145 {offsets = [0, 0], sizes = [8, 32], strides = [1, 1]} : vector<8x128xf32> to vector<8x32xf32>
    %147 = vector.extract_strided_slice %145 {offsets = [0, 32], sizes = [8, 32], strides = [1, 1]} : vector<8x128xf32> to vector<8x32xf32>
    %148 = vector.extract_strided_slice %145 {offsets = [0, 64], sizes = [8, 32], strides = [1, 1]} : vector<8x128xf32> to vector<8x32xf32>
    %149 = vector.extract_strided_slice %145 {offsets = [0, 96], sizes = [8, 32], strides = [1, 1]} : vector<8x128xf32> to vector<8x32xf32>
    %150 = arith.mulf %147, %132 : vector<8x32xf32>
    %151 = arith.mulf %146, %148 : vector<8x32xf32>
    %152 = arith.addf %150, %151 : vector<8x32xf32>
    %153 = math.tanh %152 : vector<8x32xf32>
    %154 = arith.mulf %149, %153 : vector<8x32xf32>
    %c48_45 = arith.constant 48 : index
    %c0_46 = arith.constant 0 : index
    %155 = vector.load %arg10[%c48_45, %c0_46] : memref<64x32xf32, #tpu.memory_space<vmem>>, vector<8x32xf32>
    tpu.vector_store %arg10[%c48_45, %c0_46], %154 {strides = array<i32>} : memref<64x32xf32, #tpu.memory_space<vmem>>, vector<8x32xf32>,
    %c56 = arith.constant 56 : index
    %c0_47 = arith.constant 0 : index
    %156 = vector.load %arg9[%c56, %c0_47] : memref<64x128xf32, #tpu.memory_space<vmem>>, vector<8x128xf32>
    %cst_48 = arith.constant dense<0.000000e+00> : vector<8x128xf32>
    %157 = tpu.matmul %154, %13, %cst_48 {dimension_numbers = #tpu.dot_dimension_numbers<[1], [0], [0], [1], [0, 0, 1, 1], [], []>} : vector<8x32xf32>, vector<32x128xf32>, vector<8x128xf32> -> vector<8x128xf32>
    %158 = arith.addf %156, %157 : vector<8x128xf32>
    %159 = math.tanh %158 : vector<8x128xf32>
    %160 = arith.negf %158 : vector<8x128xf32>
    %161 = math.exp %160 : vector<8x128xf32>
    %cst_49 = arith.constant 1.000000e+00 : f32
    %162 = vector.broadcast %cst_49 : f32 to vector<8x128xf32>
    %163 = arith.addf %162, %161 : vector<8x128xf32>
    %164 = arith.divf %162, %163 : vector<8x128xf32>
    %165 = arith.select %5, %159, %164 : vector<8x128xi1>, vector<8x128xf32>
    %166 = vector.extract_strided_slice %165 {offsets = [0, 0], sizes = [8, 32], strides = [1, 1]} : vector<8x128xf32> to vector<8x32xf32>
    %167 = vector.extract_strided_slice %165 {offsets = [0, 32], sizes = [8, 32], strides = [1, 1]} : vector<8x128xf32> to vector<8x32xf32>
    %168 = vector.extract_strided_slice %165 {offsets = [0, 64], sizes = [8, 32], strides = [1, 1]} : vector<8x128xf32> to vector<8x32xf32>
    %169 = vector.extract_strided_slice %165 {offsets = [0, 96], sizes = [8, 32], strides = [1, 1]} : vector<8x128xf32> to vector<8x32xf32>
    %170 = arith.mulf %167, %152 : vector<8x32xf32>
    %171 = arith.mulf %166, %168 : vector<8x32xf32>
    %172 = arith.addf %170, %171 : vector<8x32xf32>
    %173 = math.tanh %172 : vector<8x32xf32>
    %174 = arith.mulf %169, %173 : vector<8x32xf32>
    %c56_50 = arith.constant 56 : index
    %c0_51 = arith.constant 0 : index
    %175 = vector.load %arg10[%c56_50, %c0_51] : memref<64x32xf32, #tpu.memory_space<vmem>>, vector<8x32xf32>
    tpu.vector_store %arg10[%c56_50, %c0_51], %174 {strides = array<i32>} : memref<64x32xf32, #tpu.memory_space<vmem>>, vector<8x32xf32>,
    %c0_52 = arith.constant 0 : index
    %c0_53 = arith.constant 0 : index
    %176 = vector.load %arg10[%c0_52, %c0_53] : memref<64x32xf32, #tpu.memory_space<vmem>>, vector<64x32xf32>
    %c0_54 = arith.constant 0 : index
    %c0_55 = arith.constant 0 : index
    %177 = vector.load %arg4[%c0_54, %c0_55] : memref<32x128xf32, #tpu.memory_space<vmem>>, vector<32x128xf32>
    %cst_56 = arith.constant dense<0.000000e+00> : vector<64x128xf32>
    %178 = tpu.matmul %176, %177, %cst_56 {dimension_numbers = #tpu.dot_dimension_numbers<[1], [0], [0], [1], [0, 0, 1, 1], [], []>} : vector<64x32xf32>, vector<32x128xf32>, vector<64x128xf32> -> vector<64x128xf32>
    %c0_57 = arith.constant 0 : index
    %c0_58 = arith.constant 0 : index
    %179 = vector.load %arg6[%c0_57, %c0_58] : memref<1x128xf32, #tpu.memory_space<vmem>>, vector<1x128xf32>
    %180 = vector.broadcast %179 : vector<1x128xf32> to vector<64x128xf32>
    %181 = arith.addf %178, %180 : vector<64x128xf32>
    %c0_59 = arith.constant 0 : index
    %c0_60 = arith.constant 0 : index
    %182 = vector.load %arg9[%c0_59, %c0_60] : memref<64x128xf32, #tpu.memory_space<vmem>>, vector<64x128xf32>
    tpu.vector_store %arg9[%c0_59, %c0_60], %181 {strides = array<i32>} : memref<64x128xf32, #tpu.memory_space<vmem>>, vector<64x128xf32>,
    %c0_61 = arith.constant 0 : index
    %c0_62 = arith.constant 0 : index
    %183 = vector.load %arg5[%c0_61, %c0_62] : memref<32x128xf32, #tpu.memory_space<vmem>>, vector<32x128xf32>
    %cst_63 = arith.constant 0.000000e+00 : f32
    %184 = vector.broadcast %cst_63 : f32 to vector<8x32xf32>
    %cst_64 = arith.constant 0.000000e+00 : f32
    %185 = vector.broadcast %cst_64 : f32 to vector<8x32xf32>
    %c0_65 = arith.constant 0 : index
    %c0_66 = arith.constant 0 : index
    %186 = vector.load %arg9[%c0_65, %c0_66] : memref<64x128xf32, #tpu.memory_space<vmem>>, vector<8x128xf32>
    %cst_67 = arith.constant dense<0.000000e+00> : vector<8x128xf32>
    %187 = tpu.matmul %184, %183, %cst_67 {dimension_numbers = #tpu.dot_dimension_numbers<[1], [0], [0], [1], [0, 0, 1, 1], [], []>} : vector<8x32xf32>, vector<32x128xf32>, vector<8x128xf32> -> vector<8x128xf32>
    %188 = arith.addf %186, %187 : vector<8x128xf32>
    %189 = math.tanh %188 : vector<8x128xf32>
    %190 = arith.negf %188 : vector<8x128xf32>
    %191 = math.exp %190 : vector<8x128xf32>
    %cst_68 = arith.constant 1.000000e+00 : f32
    %192 = vector.broadcast %cst_68 : f32 to vector<8x128xf32>
    %193 = arith.addf %192, %191 : vector<8x128xf32>
    %194 = arith.divf %192, %193 : vector<8x128xf32>
    %195 = arith.select %5, %189, %194 : vector<8x128xi1>, vector<8x128xf32>
    %196 = vector.extract_strided_slice %195 {offsets = [0, 0], sizes = [8, 32], strides = [1, 1]} : vector<8x128xf32> to vector<8x32xf32>
    %197 = vector.extract_strided_slice %195 {offsets = [0, 32], sizes = [8, 32], strides = [1, 1]} : vector<8x128xf32> to vector<8x32xf32>
    %198 = vector.extract_strided_slice %195 {offsets = [0, 64], sizes = [8, 32], strides = [1, 1]} : vector<8x128xf32> to vector<8x32xf32>
    %199 = vector.extract_strided_slice %195 {offsets = [0, 96], sizes = [8, 32], strides = [1, 1]} : vector<8x128xf32> to vector<8x32xf32>
    %200 = arith.mulf %197, %185 : vector<8x32xf32>
    %201 = arith.mulf %196, %198 : vector<8x32xf32>
    %202 = arith.addf %200, %201 : vector<8x32xf32>
    %203 = math.tanh %202 : vector<8x32xf32>
    %204 = arith.mulf %199, %203 : vector<8x32xf32>
    %205 = math.tanh %204 : vector<8x32xf32>
    %c0_69 = arith.constant 0 : index
    %c0_70 = arith.constant 0 : index
    %206 = vector.load %arg10[%c0_69, %c0_70] : memref<64x32xf32, #tpu.memory_space<vmem>>, vector<8x32xf32>
    tpu.vector_store %arg10[%c0_69, %c0_70], %205 {strides = array<i32>} : memref<64x32xf32, #tpu.memory_space<vmem>>, vector<8x32xf32>,
    %c8_71 = arith.constant 8 : index
    %c0_72 = arith.constant 0 : index
    %207 = vector.load %arg9[%c8_71, %c0_72] : memref<64x128xf32, #tpu.memory_space<vmem>>, vector<8x128xf32>
    %cst_73 = arith.constant dense<0.000000e+00> : vector<8x128xf32>
    %208 = tpu.matmul %204, %183, %cst_73 {dimension_numbers = #tpu.dot_dimension_numbers<[1], [0], [0], [1], [0, 0, 1, 1], [], []>} : vector<8x32xf32>, vector<32x128xf32>, vector<8x128xf32> -> vector<8x128xf32>
    %209 = arith.addf %207, %208 : vector<8x128xf32>
    %210 = math.tanh %209 : vector<8x128xf32>
    %211 = arith.negf %209 : vector<8x128xf32>
    %212 = math.exp %211 : vector<8x128xf32>
    %cst_74 = arith.constant 1.000000e+00 : f32
    %213 = vector.broadcast %cst_74 : f32 to vector<8x128xf32>
    %214 = arith.addf %213, %212 : vector<8x128xf32>
    %215 = arith.divf %213, %214 : vector<8x128xf32>
    %216 = arith.select %5, %210, %215 : vector<8x128xi1>, vector<8x128xf32>
    %217 = vector.extract_strided_slice %216 {offsets = [0, 0], sizes = [8, 32], strides = [1, 1]} : vector<8x128xf32> to vector<8x32xf32>
    %218 = vector.extract_strided_slice %216 {offsets = [0, 32], sizes = [8, 32], strides = [1, 1]} : vector<8x128xf32> to vector<8x32xf32>
    %219 = vector.extract_strided_slice %216 {offsets = [0, 64], sizes = [8, 32], strides = [1, 1]} : vector<8x128xf32> to vector<8x32xf32>
    %220 = vector.extract_strided_slice %216 {offsets = [0, 96], sizes = [8, 32], strides = [1, 1]} : vector<8x128xf32> to vector<8x32xf32>
    %221 = arith.mulf %218, %202 : vector<8x32xf32>
    %222 = arith.mulf %217, %219 : vector<8x32xf32>
    %223 = arith.addf %221, %222 : vector<8x32xf32>
    %224 = math.tanh %223 : vector<8x32xf32>
    %225 = arith.mulf %220, %224 : vector<8x32xf32>
    %226 = math.tanh %225 : vector<8x32xf32>
    %c8_75 = arith.constant 8 : index
    %c0_76 = arith.constant 0 : index
    %227 = vector.load %arg10[%c8_75, %c0_76] : memref<64x32xf32, #tpu.memory_space<vmem>>, vector<8x32xf32>
    tpu.vector_store %arg10[%c8_75, %c0_76], %226 {strides = array<i32>} : memref<64x32xf32, #tpu.memory_space<vmem>>, vector<8x32xf32>,
    %c16_77 = arith.constant 16 : index
    %c0_78 = arith.constant 0 : index
    %228 = vector.load %arg9[%c16_77, %c0_78] : memref<64x128xf32, #tpu.memory_space<vmem>>, vector<8x128xf32>
    %cst_79 = arith.constant dense<0.000000e+00> : vector<8x128xf32>
    %229 = tpu.matmul %225, %183, %cst_79 {dimension_numbers = #tpu.dot_dimension_numbers<[1], [0], [0], [1], [0, 0, 1, 1], [], []>} : vector<8x32xf32>, vector<32x128xf32>, vector<8x128xf32> -> vector<8x128xf32>
    %230 = arith.addf %228, %229 : vector<8x128xf32>
    %231 = math.tanh %230 : vector<8x128xf32>
    %232 = arith.negf %230 : vector<8x128xf32>
    %233 = math.exp %232 : vector<8x128xf32>
    %cst_80 = arith.constant 1.000000e+00 : f32
    %234 = vector.broadcast %cst_80 : f32 to vector<8x128xf32>
    %235 = arith.addf %234, %233 : vector<8x128xf32>
    %236 = arith.divf %234, %235 : vector<8x128xf32>
    %237 = arith.select %5, %231, %236 : vector<8x128xi1>, vector<8x128xf32>
    %238 = vector.extract_strided_slice %237 {offsets = [0, 0], sizes = [8, 32], strides = [1, 1]} : vector<8x128xf32> to vector<8x32xf32>
    %239 = vector.extract_strided_slice %237 {offsets = [0, 32], sizes = [8, 32], strides = [1, 1]} : vector<8x128xf32> to vector<8x32xf32>
    %240 = vector.extract_strided_slice %237 {offsets = [0, 64], sizes = [8, 32], strides = [1, 1]} : vector<8x128xf32> to vector<8x32xf32>
    %241 = vector.extract_strided_slice %237 {offsets = [0, 96], sizes = [8, 32], strides = [1, 1]} : vector<8x128xf32> to vector<8x32xf32>
    %242 = arith.mulf %239, %223 : vector<8x32xf32>
    %243 = arith.mulf %238, %240 : vector<8x32xf32>
    %244 = arith.addf %242, %243 : vector<8x32xf32>
    %245 = math.tanh %244 : vector<8x32xf32>
    %246 = arith.mulf %241, %245 : vector<8x32xf32>
    %247 = math.tanh %246 : vector<8x32xf32>
    %c16_81 = arith.constant 16 : index
    %c0_82 = arith.constant 0 : index
    %248 = vector.load %arg10[%c16_81, %c0_82] : memref<64x32xf32, #tpu.memory_space<vmem>>, vector<8x32xf32>
    tpu.vector_store %arg10[%c16_81, %c0_82], %247 {strides = array<i32>} : memref<64x32xf32, #tpu.memory_space<vmem>>, vector<8x32xf32>,
    %c24_83 = arith.constant 24 : index
    %c0_84 = arith.constant 0 : index
    %249 = vector.load %arg9[%c24_83, %c0_84] : memref<64x128xf32, #tpu.memory_space<vmem>>, vector<8x128xf32>
    %cst_85 = arith.constant dense<0.000000e+00> : vector<8x128xf32>
    %250 = tpu.matmul %246, %183, %cst_85 {dimension_numbers = #tpu.dot_dimension_numbers<[1], [0], [0], [1], [0, 0, 1, 1], [], []>} : vector<8x32xf32>, vector<32x128xf32>, vector<8x128xf32> -> vector<8x128xf32>
    %251 = arith.addf %249, %250 : vector<8x128xf32>
    %252 = math.tanh %251 : vector<8x128xf32>
    %253 = arith.negf %251 : vector<8x128xf32>
    %254 = math.exp %253 : vector<8x128xf32>
    %cst_86 = arith.constant 1.000000e+00 : f32
    %255 = vector.broadcast %cst_86 : f32 to vector<8x128xf32>
    %256 = arith.addf %255, %254 : vector<8x128xf32>
    %257 = arith.divf %255, %256 : vector<8x128xf32>
    %258 = arith.select %5, %252, %257 : vector<8x128xi1>, vector<8x128xf32>
    %259 = vector.extract_strided_slice %258 {offsets = [0, 0], sizes = [8, 32], strides = [1, 1]} : vector<8x128xf32> to vector<8x32xf32>
    %260 = vector.extract_strided_slice %258 {offsets = [0, 32], sizes = [8, 32], strides = [1, 1]} : vector<8x128xf32> to vector<8x32xf32>
    %261 = vector.extract_strided_slice %258 {offsets = [0, 64], sizes = [8, 32], strides = [1, 1]} : vector<8x128xf32> to vector<8x32xf32>
    %262 = vector.extract_strided_slice %258 {offsets = [0, 96], sizes = [8, 32], strides = [1, 1]} : vector<8x128xf32> to vector<8x32xf32>
    %263 = arith.mulf %260, %244 : vector<8x32xf32>
    %264 = arith.mulf %259, %261 : vector<8x32xf32>
    %265 = arith.addf %263, %264 : vector<8x32xf32>
    %266 = math.tanh %265 : vector<8x32xf32>
    %267 = arith.mulf %262, %266 : vector<8x32xf32>
    %268 = math.tanh %267 : vector<8x32xf32>
    %c24_87 = arith.constant 24 : index
    %c0_88 = arith.constant 0 : index
    %269 = vector.load %arg10[%c24_87, %c0_88] : memref<64x32xf32, #tpu.memory_space<vmem>>, vector<8x32xf32>
    tpu.vector_store %arg10[%c24_87, %c0_88], %268 {strides = array<i32>} : memref<64x32xf32, #tpu.memory_space<vmem>>, vector<8x32xf32>,
    %c32_89 = arith.constant 32 : index
    %c0_90 = arith.constant 0 : index
    %270 = vector.load %arg9[%c32_89, %c0_90] : memref<64x128xf32, #tpu.memory_space<vmem>>, vector<8x128xf32>
    %cst_91 = arith.constant dense<0.000000e+00> : vector<8x128xf32>
    %271 = tpu.matmul %267, %183, %cst_91 {dimension_numbers = #tpu.dot_dimension_numbers<[1], [0], [0], [1], [0, 0, 1, 1], [], []>} : vector<8x32xf32>, vector<32x128xf32>, vector<8x128xf32> -> vector<8x128xf32>
    %272 = arith.addf %270, %271 : vector<8x128xf32>
    %273 = math.tanh %272 : vector<8x128xf32>
    %274 = arith.negf %272 : vector<8x128xf32>
    %275 = math.exp %274 : vector<8x128xf32>
    %cst_92 = arith.constant 1.000000e+00 : f32
    %276 = vector.broadcast %cst_92 : f32 to vector<8x128xf32>
    %277 = arith.addf %276, %275 : vector<8x128xf32>
    %278 = arith.divf %276, %277 : vector<8x128xf32>
    %279 = arith.select %5, %273, %278 : vector<8x128xi1>, vector<8x128xf32>
    %280 = vector.extract_strided_slice %279 {offsets = [0, 0], sizes = [8, 32], strides = [1, 1]} : vector<8x128xf32> to vector<8x32xf32>
    %281 = vector.extract_strided_slice %279 {offsets = [0, 32], sizes = [8, 32], strides = [1, 1]} : vector<8x128xf32> to vector<8x32xf32>
    %282 = vector.extract_strided_slice %279 {offsets = [0, 64], sizes = [8, 32], strides = [1, 1]} : vector<8x128xf32> to vector<8x32xf32>
    %283 = vector.extract_strided_slice %279 {offsets = [0, 96], sizes = [8, 32], strides = [1, 1]} : vector<8x128xf32> to vector<8x32xf32>
    %284 = arith.mulf %281, %265 : vector<8x32xf32>
    %285 = arith.mulf %280, %282 : vector<8x32xf32>
    %286 = arith.addf %284, %285 : vector<8x32xf32>
    %287 = math.tanh %286 : vector<8x32xf32>
    %288 = arith.mulf %283, %287 : vector<8x32xf32>
    %289 = math.tanh %288 : vector<8x32xf32>
    %c32_93 = arith.constant 32 : index
    %c0_94 = arith.constant 0 : index
    %290 = vector.load %arg10[%c32_93, %c0_94] : memref<64x32xf32, #tpu.memory_space<vmem>>, vector<8x32xf32>
    tpu.vector_store %arg10[%c32_93, %c0_94], %289 {strides = array<i32>} : memref<64x32xf32, #tpu.memory_space<vmem>>, vector<8x32xf32>,
    %c40_95 = arith.constant 40 : index
    %c0_96 = arith.constant 0 : index
    %291 = vector.load %arg9[%c40_95, %c0_96] : memref<64x128xf32, #tpu.memory_space<vmem>>, vector<8x128xf32>
    %cst_97 = arith.constant dense<0.000000e+00> : vector<8x128xf32>
    %292 = tpu.matmul %288, %183, %cst_97 {dimension_numbers = #tpu.dot_dimension_numbers<[1], [0], [0], [1], [0, 0, 1, 1], [], []>} : vector<8x32xf32>, vector<32x128xf32>, vector<8x128xf32> -> vector<8x128xf32>
    %293 = arith.addf %291, %292 : vector<8x128xf32>
    %294 = math.tanh %293 : vector<8x128xf32>
    %295 = arith.negf %293 : vector<8x128xf32>
    %296 = math.exp %295 : vector<8x128xf32>
    %cst_98 = arith.constant 1.000000e+00 : f32
    %297 = vector.broadcast %cst_98 : f32 to vector<8x128xf32>
    %298 = arith.addf %297, %296 : vector<8x128xf32>
    %299 = arith.divf %297, %298 : vector<8x128xf32>
    %300 = arith.select %5, %294, %299 : vector<8x128xi1>, vector<8x128xf32>
    %301 = vector.extract_strided_slice %300 {offsets = [0, 0], sizes = [8, 32], strides = [1, 1]} : vector<8x128xf32> to vector<8x32xf32>
    %302 = vector.extract_strided_slice %300 {offsets = [0, 32], sizes = [8, 32], strides = [1, 1]} : vector<8x128xf32> to vector<8x32xf32>
    %303 = vector.extract_strided_slice %300 {offsets = [0, 64], sizes = [8, 32], strides = [1, 1]} : vector<8x128xf32> to vector<8x32xf32>
    %304 = vector.extract_strided_slice %300 {offsets = [0, 96], sizes = [8, 32], strides = [1, 1]} : vector<8x128xf32> to vector<8x32xf32>
    %305 = arith.mulf %302, %286 : vector<8x32xf32>
    %306 = arith.mulf %301, %303 : vector<8x32xf32>
    %307 = arith.addf %305, %306 : vector<8x32xf32>
    %308 = math.tanh %307 : vector<8x32xf32>
    %309 = arith.mulf %304, %308 : vector<8x32xf32>
    %310 = math.tanh %309 : vector<8x32xf32>
    %c40_99 = arith.constant 40 : index
    %c0_100 = arith.constant 0 : index
    %311 = vector.load %arg10[%c40_99, %c0_100] : memref<64x32xf32, #tpu.memory_space<vmem>>, vector<8x32xf32>
    tpu.vector_store %arg10[%c40_99, %c0_100], %310 {strides = array<i32>} : memref<64x32xf32, #tpu.memory_space<vmem>>, vector<8x32xf32>,
    %c48_101 = arith.constant 48 : index
    %c0_102 = arith.constant 0 : index
    %312 = vector.load %arg9[%c48_101, %c0_102] : memref<64x128xf32, #tpu.memory_space<vmem>>, vector<8x128xf32>
    %cst_103 = arith.constant dense<0.000000e+00> : vector<8x128xf32>
    %313 = tpu.matmul %309, %183, %cst_103 {dimension_numbers = #tpu.dot_dimension_numbers<[1], [0], [0], [1], [0, 0, 1, 1], [], []>} : vector<8x32xf32>, vector<32x128xf32>, vector<8x128xf32> -> vector<8x128xf32>
    %314 = arith.addf %312, %313 : vector<8x128xf32>
    %315 = math.tanh %314 : vector<8x128xf32>
    %316 = arith.negf %314 : vector<8x128xf32>
    %317 = math.exp %316 : vector<8x128xf32>
    %cst_104 = arith.constant 1.000000e+00 : f32
    %318 = vector.broadcast %cst_104 : f32 to vector<8x128xf32>
    %319 = arith.addf %318, %317 : vector<8x128xf32>
    %320 = arith.divf %318, %319 : vector<8x128xf32>
    %321 = arith.select %5, %315, %320 : vector<8x128xi1>, vector<8x128xf32>
    %322 = vector.extract_strided_slice %321 {offsets = [0, 0], sizes = [8, 32], strides = [1, 1]} : vector<8x128xf32> to vector<8x32xf32>
    %323 = vector.extract_strided_slice %321 {offsets = [0, 32], sizes = [8, 32], strides = [1, 1]} : vector<8x128xf32> to vector<8x32xf32>
    %324 = vector.extract_strided_slice %321 {offsets = [0, 64], sizes = [8, 32], strides = [1, 1]} : vector<8x128xf32> to vector<8x32xf32>
    %325 = vector.extract_strided_slice %321 {offsets = [0, 96], sizes = [8, 32], strides = [1, 1]} : vector<8x128xf32> to vector<8x32xf32>
    %326 = arith.mulf %323, %307 : vector<8x32xf32>
    %327 = arith.mulf %322, %324 : vector<8x32xf32>
    %328 = arith.addf %326, %327 : vector<8x32xf32>
    %329 = math.tanh %328 : vector<8x32xf32>
    %330 = arith.mulf %325, %329 : vector<8x32xf32>
    %331 = math.tanh %330 : vector<8x32xf32>
    %c48_105 = arith.constant 48 : index
    %c0_106 = arith.constant 0 : index
    %332 = vector.load %arg10[%c48_105, %c0_106] : memref<64x32xf32, #tpu.memory_space<vmem>>, vector<8x32xf32>
    tpu.vector_store %arg10[%c48_105, %c0_106], %331 {strides = array<i32>} : memref<64x32xf32, #tpu.memory_space<vmem>>, vector<8x32xf32>,
    %c56_107 = arith.constant 56 : index
    %c0_108 = arith.constant 0 : index
    %333 = vector.load %arg9[%c56_107, %c0_108] : memref<64x128xf32, #tpu.memory_space<vmem>>, vector<8x128xf32>
    %cst_109 = arith.constant dense<0.000000e+00> : vector<8x128xf32>
    %334 = tpu.matmul %330, %183, %cst_109 {dimension_numbers = #tpu.dot_dimension_numbers<[1], [0], [0], [1], [0, 0, 1, 1], [], []>} : vector<8x32xf32>, vector<32x128xf32>, vector<8x128xf32> -> vector<8x128xf32>
    %335 = arith.addf %333, %334 : vector<8x128xf32>
    %336 = math.tanh %335 : vector<8x128xf32>
    %337 = arith.negf %335 : vector<8x128xf32>
    %338 = math.exp %337 : vector<8x128xf32>
    %cst_110 = arith.constant 1.000000e+00 : f32
    %339 = vector.broadcast %cst_110 : f32 to vector<8x128xf32>
    %340 = arith.addf %339, %338 : vector<8x128xf32>
    %341 = arith.divf %339, %340 : vector<8x128xf32>
    %342 = arith.select %5, %336, %341 : vector<8x128xi1>, vector<8x128xf32>
    %343 = vector.extract_strided_slice %342 {offsets = [0, 0], sizes = [8, 32], strides = [1, 1]} : vector<8x128xf32> to vector<8x32xf32>
    %344 = vector.extract_strided_slice %342 {offsets = [0, 32], sizes = [8, 32], strides = [1, 1]} : vector<8x128xf32> to vector<8x32xf32>
    %345 = vector.extract_strided_slice %342 {offsets = [0, 64], sizes = [8, 32], strides = [1, 1]} : vector<8x128xf32> to vector<8x32xf32>
    %346 = vector.extract_strided_slice %342 {offsets = [0, 96], sizes = [8, 32], strides = [1, 1]} : vector<8x128xf32> to vector<8x32xf32>
    %347 = arith.mulf %344, %328 : vector<8x32xf32>
    %348 = arith.mulf %343, %345 : vector<8x32xf32>
    %349 = arith.addf %347, %348 : vector<8x32xf32>
    %350 = math.tanh %349 : vector<8x32xf32>
    %351 = arith.mulf %346, %350 : vector<8x32xf32>
    %352 = math.tanh %351 : vector<8x32xf32>
    %c56_111 = arith.constant 56 : index
    %c0_112 = arith.constant 0 : index
    %353 = vector.load %arg10[%c56_111, %c0_112] : memref<64x32xf32, #tpu.memory_space<vmem>>, vector<8x32xf32>
    tpu.vector_store %arg10[%c56_111, %c0_112], %352 {strides = array<i32>} : memref<64x32xf32, #tpu.memory_space<vmem>>, vector<8x32xf32>,
    %c0_113 = arith.constant 0 : index
    %c0_114 = arith.constant 0 : index
    %354 = vector.load %arg10[%c0_113, %c0_114] : memref<64x32xf32, #tpu.memory_space<vmem>>, vector<64x32xf32>
    %c0_115 = arith.constant 0 : index
    %c0_116 = arith.constant 0 : index
    %355 = vector.load %arg7[%c0_115, %c0_116] : memref<32x128xf32, #tpu.memory_space<vmem>>, vector<32x128xf32>
    %cst_117 = arith.constant dense<0.000000e+00> : vector<64x128xf32>
    %356 = tpu.matmul %354, %355, %cst_117 {dimension_numbers = #tpu.dot_dimension_numbers<[1], [0], [0], [1], [0, 0, 1, 1], [], []>} : vector<64x32xf32>, vector<32x128xf32>, vector<64x128xf32> -> vector<64x128xf32>
    %c0_118 = arith.constant 0 : index
    %c0_119 = arith.constant 0 : index
    %357 = vector.load %arg8[%c0_118, %c0_119] : memref<64x128xf32, #tpu.memory_space<vmem>>, vector<64x128xf32>
    tpu.vector_store %arg8[%c0_118, %c0_119], %356 {strides = array<i32>} : memref<64x128xf32, #tpu.memory_space<vmem>>, vector<64x128xf32>,
    return
  }
}

</mosaic_0001>

<bundles_post_ra>
// kernel: custom-call
= control target key start
LH: loop header
LB: loop body
LE: loop exit
PB: predicated region body
PF: predicated region fallthrough
CT: control target
= control target key end

     0   :  { %s126_s0 = inlined_call_operand.vmem [shape: f32[2,8,4,4], index: 0, kind: input, shape index: {}]   ;;  %s127_s1 = inlined_call_operand.vmem [shape: f32[2,8,4,4], index: 1, kind: input, shape index: {}]   ;;  %s128_s2 = inlined_call_operand.hbm [shape: c64[2,8,4,4], index: 2, kind: output, shape index: {}]  }
   0x1   :  { %s87_s11 = scalar_lea.hbm %s128_s2, 512 }
   0x2   :  { %4 = vsyncpa [#allocation0], 0  ;;  %s5_s14 = sshll.u32 %s126_s0, 4  ;;  %s6_s14 = int_to_ptr.vmem [resolvable:$true] %s5_s14 }
   0x3   :  { %s18_s15 = scalar_lea.vmem %s6_s14, 512  ;;  %p23_p1 = scmp.lt.s32.totalorder %s6_s14, %s6_s14 }
   0x4   :  { %p19_p0 = scmp.ne.s32.totalorder %s6_s14, %s18_s15  ;;  %p24_p2 = scmp.lt.s32.totalorder %s18_s15, %s18_s15 }
   0x6   :  { %p25_p3 = por %p24_p2, %p23_p1 }
   0x8   :  { %p26_p4 = pnand %p25_p3, %p19_p0 }
   0xa   :  { %29 = shalt.err (!%p26_p4)  }
   0xb   :  { %p31_p5 = scmp.ne.s32.totalorder %s128_s2, %s87_s11  ;;  %s32_s0 = scalar_lea.hbm %s128_s2, 1024 }
   0xc   :  { %p33_p6 = scmp.lt.u32.totalorder %s32_s0, %s87_s11  ;;  %p34_p7 = scmp.lt.u32.totalorder %s87_s11, %s128_s2 }
   0xe   :  { %p35_p8 = por %p34_p7, %p33_p6 }
  0x10   :  { %p36_p9 = pnand %p35_p8, %p31_p5 }
  0x12   :  { %39 = shalt.err (!%p36_p9)  }
  0x13   :  { %8 = dma.vmem_to_hbm [thread:$0]  %s6_s14, 512, %s128_s2, [#allocation0] }
  0x14   :  { %65 = dma.done.wait [#allocation0], 512  }
  0x15   :  { %66 = vsyncadd [#allocation0], 4294966784 }
  0x16   :  { %10 = vsyncpa [#allocation0], 1 }
  0x17   :  { %11 = vsyncpa [#allocation1], 0  ;;  %s12_s28 = sshll.u32 %s127_s1, 4  ;;  %s13_s28 = int_to_ptr.vmem [resolvable:$true] %s12_s28 }
  0x18   :  { %s40_s29 = scalar_lea.vmem %s13_s28, 512  ;;  %p45_p11 = scmp.lt.s32.totalorder %s13_s28, %s13_s28 }
  0x19   :  { %p41_p10 = scmp.ne.s32.totalorder %s13_s28, %s40_s29  ;;  %p46_p12 = scmp.lt.s32.totalorder %s40_s29, %s40_s29 }
  0x1b   :  { %p47_p13 = por %p46_p12, %p45_p11 }
  0x1d   :  { %p48_p0 = pnand %p47_p13, %p41_p10 }
  0x1f   :  { %51 = shalt.err (!%p48_p0)  }
  0x20   :  { %p53_p1 = scmp.ne.s32.totalorder %s87_s11, %s32_s0  ;;  %p56_p2 = scmp.lt.u32.totalorder %s32_s0, %s32_s0 }
  0x22   :  { %p57_p3 = por %p56_p2, %p34_p7 }
  0x24   :  { %p59_p4 = por %p57_p3, %p33_p6 }
  0x26   :  { %p60_p5 = pnand %p59_p4, %p53_p1 }
  0x28   :  { %63 = shalt.err (!%p60_p5)  }
  0x29   :  { %15 = dma.vmem_to_hbm [thread:$0]  %s13_s28, 512, %s87_s11, [#allocation1] }
  0x2a   :  { %67 = dma.done.wait [#allocation1], 512  }
  0x2b   :  { %68 = vsyncadd [#allocation1], 4294966784 }
  0x2c   :  { %17 = vsyncpa [#allocation1], 1 }

// kernel: lstm_regressor_forward.1
= control target key start
LH: loop header
LB: loop body
LE: loop exit
PB: predicated region body
PF: predicated region fallthrough
CT: control target
= control target key end

     0   :  { %13 = vsyncpa [#allocation5], 0  ;;  %s2907_s27 = smov [#allocation4]   ;;  %s3417_s0 = inlined_call_operand.vmem [shape: f32[64,3], index: 0, kind: input, shape index: {}]   ;;  %s3418_s1 = inlined_call_operand.vmem [shape: f32[3,128], index: 1, kind: input, shape index: {}]   ;;  %s3419_s2 = inlined_call_operand.hbm [shape: f32[32,128], index: 2, kind: input, shape index: {}]   ;;  %s3420_s3 = inlined_call_operand.vmem [shape: f32[1,128], index: 3, kind: input, shape index: {}]   ;;  %s3421_s4 = inlined_call_operand.vmem [shape: f32[32,128], index: 4, kind: input, shape index: {}]   ;;  %s3422_s5 = inlined_call_operand.vmem [shape: f32[32,128], index: 5, kind: input, shape index: {}]   ;;  %s3423_s6 = inlined_call_operand.vmem [shape: f32[1,128], index: 6, kind: input, shape index: {}]   ;;  %s3424_s7 = inlined_call_operand.vmem [shape: f32[32,128], index: 7, kind: input, shape index: {}]   ;;  %s3425_s8 = inlined_call_operand.vmem [shape: f32[64,128], index: 8, kind: output, shape index: {}]  }
   0x1   :  { %s23_s28 = sshll.u32 %s2907_s27, 4  ;;  %s2883_s9 = scalar_lea.hbm %s3419_s2, 512  ;;  %s24_s28 = int_to_ptr.vmem [resolvable:$true] %s23_s28 }
   0x2   :  { %p2884_p0 = scmp.ne.s32.totalorder %s3419_s2, %s2883_s9  ;;  %p2887_p1 = scmp.lt.u32.totalorder %s2883_s9, %s3419_s2 }
   0x4   :  { %p2889_p2 = pnand %p2887_p1, %p2884_p0 }
   0x6   :  { %2892 = shalt.err (!%p2889_p2)
}
   0x7   :  { %s2893_s14 = scalar_lea.vmem %s24_s28, 512  ;;  %p2898_p4 = scmp.lt.s32.totalorder %s24_s28, %s24_s28 }
   0x8   :  { %p2894_p3 = scmp.ne.s32.totalorder %s24_s28, %s2893_s14  ;;  %p2899_p5 = scmp.lt.s32.totalorder %s2893_s14, %s2893_s14 }
   0xa   :  { %p2900_p6 = por %p2899_p5, %p2898_p4 }
   0xc   :  { %p2901_p7 = pnand %p2900_p6, %p2894_p3 }
   0xe   :  { %2904 = shalt.err (!%p2901_p7)
}
   0xf   :  { %s2908_s15 = smov 128   ;;  %s2909_s16 = smov 8  }
  0x10   :  { %29 = dma.hbm_to_vmem [thread:$0]  %s3419_s2, 512, %s24_s28, [#allocation5], %s2908_s15, %s2908_s15, %s2909_s16  }
  0x11   :  { %2905 = dma.done.wait [#allocation5], 512  }
  0x12   :  { %2906 = vsyncadd [#allocation5], 4294966784  ;;  %vm89_vm0 = vcmask 1042432   ;;  %vm64_vm1 = vcmask 23552   ;;  %v56_v0 = vld [vmem:[%s3418_s1] sm:$0x7]  ;;  %v43_v28 = vlaneseq }
  0x13   :  { %v52_v1 = vld [vmem:[%s3417_s0 + $0x20] sm:$0xff]  ;;  %v53_v2 = vld [vmem:[%s3417_s0 + $0x28] sm:$0xff]  ;;  %2729 = vmatprep.subr.msk.mxu1 %vm89_vm0, %v56_v0  ;;  %v54_v5 = vld [vmem:[%s3417_s0 + $0x30] sm:$0xff]  ;;  %2387 = vmatprep.subr.msk.mxu0 %vm89_vm0, %v56_v0  ;;  %v2910_v8 = vmov 0.0|0.0   ;;  %vm2911_vm2 = vmmov 0   ;;  %v2912_v14 = vmov 0.0  }
  0x14   :  { %2395 = vmatprep.mubr.msk.f32.mxu1 %vm64_vm1, %v52_v1  ;;  %v206_v3 = vld [vmem:[#allocation4] sm:$0xff]  ;;  %v207_v4 = vld [vmem:[#allocation4 + $0x8] sm:$0xff]  ;;  %2730 = vmatpush3.msk.msra.mxu1 %vm89_vm0, %v56_v0  ;;  %v208_v10 = vld [vmem:[#allocation4 + $0x10] sm:$0xff]  ;;  %v44_v30 = vand.u32 127, %v43_v28  ;;  %s2914_s11 = smov 32   ;;  %vm211_vm6 = vcmask 261120  }
  0x15   :  { %v2987_v6 = vpack.c.bf16 %v207_v4, %v206_v3  ;;  %v48_v7 = vld [vmem:[%s3417_s0] sm:$0xff]  ;;  %2396 = vmatmul.mubr.msk.f32.vlgmr.msra.gmra.mrb[0].mxu1 %vm64_vm1, %v53_v2  ;;  %2617 = vmatprep.subr.bf16.mxu1 %v2910_v8  ;;  %v49_v9 = vld [vmem:[%s3417_s0 + $0x8] sm:$0xff]  ;;  %v209_v11 = vld [vmem:[#allocation4 + $0x18] sm:$0xff] }
  0x16   :  { %2398 = vmatprep.mubr.msk.f32.mxu1 %vm64_vm1, %v54_v5  ;;  %v55_v12 = vld [vmem:[%s3417_s0 + $0x38] sm:$0xff]  ;;  %v3003_v13 = vpack.c.bf16 %v209_v11, %v208_v10  ;;  %2388 = vmatpush3.msk.msra.mxu0 %vm89_vm0, %v56_v0  ;;  %v3033_v18 = vld [vmem:[%s3420_s3] ss:$0 sm:$0xff]  ;;  %vm45_vm3 = vcmp.ge.s32.totalorder %v44_v30, 64  ;;  %vm46_vm4 = vcmp.lt.s32.totalorder %v44_v30, 96  ;;  %s2913_s3 = smov 64  }
  0x17   :  { %2619 = vmatpush3.bf16.msra.mxu1 %v2987_v6  ;;  %2389 = vmatprep.mubr.msk.f32.mxu0 %vm64_vm1, %v48_v7  ;;  %vm3040_vm5 = vmand %vm45_vm3, %vm46_vm4  ;;  %v50_v59 = vld [vmem:[%s3417_s0 + $0x10] sm:$0xff]  ;;  %v51_v60 = vld [vmem:[%s3417_s0 + $0x18] sm:$0xff] }
  0x18   :  { %2620 = vmatprep.subr.bf16.mxu1 %v2910_v8  ;;  %2390 = vmatmul.mubr.msk.f32.vlgmr.msra.gmra.mrb[0].mxu0 %vm64_vm1, %v49_v9 }
  0x19   :  { %2399 = vmatmul.mubr.msk.f32.gmra.mrb[2].mxu1 %vm64_vm1, %v55_v12  ;;  %2629 = vmatprep.subr.bf16.mxu0 %v2910_v8 }
  0x1a   :  { %2409 = vmatprep.mubr.msk.f32.mxu1 %vm2911_vm2, %v2912_v14  ;;  %2631 = vmatpush3.bf16.msra.mxu0 %v2987_v6 }
  0x1b   :  { %2622 = vmatpush3.bf16.msra.mxu1 %v3003_v13  ;;  %2632 = vmatprep.subr.bf16.mxu0 %v2910_v8 }
  0x1c   :  { %2623 = vmatprep.subr.bf16.mxu1 %v2910_v8  ;;  %2392 = vmatprep.mubr.msk.f32.mxu0 %vm64_vm1, %v50_v59 }
  0x1d   :  { %2393 = vmatmul.mubr.msk.f32.gmra.mrb[2].mxu0 %vm64_vm1, %v51_v60 }
  0x1e   :  { %2410 = vmatmul.mubr.f32.vlgmr.msra.gmra.mrb[4].mxu1 %v2912_v14  ;;  %2634 = vmatpush3.bf16.msra.mxu0 %v3003_v13 }
  0x1f   :  { %2625 = vmatpush3.bf16.msra.mxu1 %v2987_v6  ;;  %2420 = vmatprep.mubr.msk.f32.mxu1 %vm2911_vm2, %v2912_v14 }
  0x20   :  { %2626 = vmatprep.subr.bf16.mxu1 %v2910_v8  ;;  %2641 = vmatprep.subr.bf16.mxu0 %v2910_v8 }
  0x21   :  { %2431 = vmatprep.mubr.msk.f32.mxu0 %vm2911_vm2, %v2912_v14 }
  0x23   :  { %2628 = vmatpush3.bf16.msra.mxu1 %v3003_v13 }
  0x24   :  { %2635 = vmatprep.subr.bf16.mxu1 %v2910_v8 }
  0xe8   :  { %v3026_v15 = vpop.f32.mrb[0].mxu1 }
  0xe9   :  { %v3028_v16 = vpop.f32.mrb[1].mxu1 }
  0xeb   :  { %v2391_v17 = vpop.f32.mrb[0].mxu0 }
  0xec   :  { %v3035_v19 = vpop.f32.mrb[2].mxu1  ;;  %v159_v20 = vpop.f32.mrb[1].mxu0  ;;  %v165_v44 = vadd.f32 %v2391_v17, %v3033_v18 }
  0xed   :  { %v3037_v21 = vpop.f32.mrb[3].mxu1  ;;  %v160_v22 = vadd.f32 %v3033_v18, %v159_v20 }
  0xf0   :  { %v2394_v0 = vpop.f32.mrb[2].mxu0 }
  0xf1   :  { %v281_v23 = vpop.f32.mrb[4].mxu1  ;;  %v169_v1 = vpop.f32.mrb[3].mxu0 }
  0xf2   :  { %v285_v24 = vadd.f32 %v281_v23, %v160_v22  ;;  %v2411_v25 = vpop.f32.mrb[5].mxu1  ;;  %v170_v3 = vadd.f32 %v3033_v18, %v169_v1 }
  0xf4   :  { %v2227_v26 = vmul.f32 -1.442695, %v285_v24 }
  0xf6   :  { %2739 = vpow2.f32 %v2227_v26 }
  0xf7   :  { %2741 = vtanh.f32 %v285_v24 }
 0x100   :  { %v2740_v27 = vpop.eup %2739 }
 0x101   :  { %v290_v29 = vadd.f32 1.0, %v2740_v27  ;;  %v2742_v32 = vpop.eup %2741 }
 0x103   :  { %2743 = vrcp.f32 %v290_v29 }
 0x10d   :  { %v2744_v33 = vpop.eup %2743 }
 0x10e   :  { %v293_v34 = vsel %vm3040_vm5, %v2742_v32, %v2744_v33  ;;  %v175_v32 = vadd.f32 %v2394_v0, %v3033_v18 }
 0x10f   :  { %296 = vrot.lane.b32.xlu0 %v293_v34, %s2913_s3  ;;  %v294_v37 = vmul.f32 0.0, %v293_v34 }
 0x181   :  { %v297_v35 = vpop.permute.xlu0 %296 }
 0x182   :  { %v299_v36 = vmul.f32 %v297_v35, %v293_v34 }
 0x184   :  { %301 = vrot.lane.b32.xlu0 %v299_v36, %s2914_s11 }
 0x1f6   :  { %v302_v38 = vpop.permute.xlu0 %301 }
 0x1f7   :  { %v304_v39 = vadd.f32 %v302_v38, %v294_v37 }
 0x1f9   :  { %2745 = vtanh.f32 %v304_v39 }
 0x203   :  { %v2746_v40 = vpop.eup %2745 }
 0x204   :  { %307 = vrot.lane.b32.xlu1 %v2746_v40, %s2913_s3 }
 0x276   :  { %v308_v41 = vpop.permute.xlu1 %307 }
 0x277   :  { %v310_v42 = vmul.f32 %v308_v41, %v293_v34 }
 0x279   :  { %312 = vrot.lane.b32.xlu1 %v310_v42, %s2914_s11 }
 0x2eb   :  { %v313_v43 = vpop.permute.xlu1 %312 }
 0x2ec   :  { %315 = vst.msk [vmem:[#allocation3] sm:$0xff] %vm211_vm6, %v313_v43  ;;  %2421 = vmatmul.mubr.msk.f32.vlgmr.msra.gmra.mrb[6].mxu1 %vm211_vm6, %v313_v43 }
 0x2ed   :  { %2637 = vmatpush3.bf16.msra.mxu1 %v2987_v6  ;;  %2442 = vmatprep.mubr.msk.f32.mxu1 %vm2911_vm2, %v2912_v14 }
 0x2ee   :  { %2638 = vmatprep.subr.bf16.mxu1 %v2910_v8 }
 0x2f1   :  { %2640 = vmatpush3.bf16.msra.mxu1 %v3003_v13 }
 0x2f2   :  { %2647 = vmatprep.subr.bf16.mxu1 %v2910_v8 }
 0x3bf   :  { %v385_v45 = vpop.f32.mrb[6].mxu1 }
 0x3c0   :  { %v389_v46 = vadd.f32 %v385_v45, %v165_v44  ;;  %v2422_v47 = vpop.f32.mrb[7].mxu1 }
 0x3c2   :  { %v2229_v48 = vmul.f32 -1.442695, %v389_v46 }
 0x3c4   :  { %2747 = vpow2.f32 %v2229_v48 }
 0x3c5   :  { %2749 = vtanh.f32 %v389_v46 }
 0x3ce   :  { %v2748_v49 = vpop.eup %2747 }
 0x3cf   :  { %v394_v50 = vadd.f32 1.0, %v2748_v49  ;;  %v2750_v51 = vpop.eup %2749 }
 0x3d1   :  { %2751 = vrcp.f32 %v394_v50 }
 0x3db   :  { %v2752_v52 = vpop.eup %2751 }
 0x3dc   :  { %v397_v53 = vsel %vm3040_vm5, %v2750_v51, %v2752_v52  ;;  %v180_v51 = vadd.f32 %v3033_v18, %v3028_v16 }
 0x3dd   :  { %400 = vrot.lane.b32.xlu0 %v397_v53, %s2913_s3  ;;  %v398_v56 = vmul.f32 %v397_v53, %v304_v39 }
 0x44f   :  { %v401_v54 = vpop.permute.xlu0 %400 }
 0x450   :  { %v403_v55 = vmul.f32 %v401_v54, %v397_v53 }
 0x452   :  { %405 = vrot.lane.b32.xlu1 %v403_v55, %s2914_s11 }
 0x4c4   :  { %v406_v57 = vpop.permute.xlu1 %405 }
 0x4c5   :  { %v408_v58 = vadd.f32 %v406_v57, %v398_v56 }
 0x4c7   :  { %2753 = vtanh.f32 %v408_v58 }
 0x4d1   :  { %v2754_v61 = vpop.eup %2753 }
 0x4d2   :  { %411 = vrot.lane.b32.xlu0 %v2754_v61, %s2913_s3 }
 0x544   :  { %v412_v62 = vpop.permute.xlu0 %411 }
 0x545   :  { %v414_v63 = vmul.f32 %v412_v62, %v397_v53 }
 0x547   :  { %416 = vrot.lane.b32.xlu1 %v414_v63, %s2914_s11 }
 0x5b9   :  { %v417_v2 = vpop.permute.xlu1 %416 }
 0x5ba   :  { %419 = vst.msk [vmem:[#allocation3 + $0x8] sm:$0xff] %vm211_vm6, %v417_v2  ;;  %2432 = vmatmul.mubr.msk.f32.vlgmr.msra.gmra.mrb[4].mxu0 %vm211_vm6, %v417_v2 }
 0x5bb   :  { %2643 = vmatpush3.bf16.msra.mxu0 %v2987_v6  ;;  %2453 = vmatprep.mubr.msk.f32.mxu0 %vm2911_vm2, %v2912_v14 }
 0x5bc   :  { %2644 = vmatprep.subr.bf16.mxu0 %v2910_v8 }
 0x5bf   :  { %2646 = vmatpush3.bf16.msra.mxu0 %v3003_v13 }
 0x5c0   :  { %2653 = vmatprep.subr.bf16.mxu0 %v2910_v8 }
 0x68d   :  { %v489_v4 = vpop.f32.mrb[4].mxu0 }
 0x68e   :  { %v493_v5 = vadd.f32 %v489_v4, %v170_v3  ;;  %v2433_v7 = vpop.f32.mrb[5].mxu0 }
 0x690   :  { %v2231_v9 = vmul.f32 -1.442695, %v493_v5 }
 0x692   :  { %2755 = vpow2.f32 %v2231_v9 }
 0x693   :  { %2757 = vtanh.f32 %v493_v5  ;;  %v185_v5 = vadd.f32 %v3026_v15, %v3033_v18 }
 0x69c   :  { %v2756_v10 = vpop.eup %2755 }
 0x69d   :  { %v498_v11 = vadd.f32 1.0, %v2756_v10  ;;  %v2758_v12 = vpop.eup %2757 }
 0x69f   :  { %2759 = vrcp.f32 %v498_v11 }
 0x6a9   :  { %v2760_v17 = vpop.eup %2759 }
 0x6aa   :  { %v501_v20 = vsel %vm3040_vm5, %v2758_v12, %v2760_v17 }
 0x6ab   :  { %504 = vrot.lane.b32.xlu0 %v501_v20, %s2913_s3  ;;  %v502_v24 = vmul.f32 %v501_v20, %v408_v58 }
 0x71d   :  { %v505_v22 = vpop.permute.xlu0 %504 }
 0x71e   :  { %v507_v23 = vmul.f32 %v505_v22, %v501_v20 }
 0x720   :  { %509 = vrot.lane.b32.xlu1 %v507_v23, %s2914_s11 }
 0x792   :  { %v510_v25 = vpop.permute.xlu1 %509 }
 0x793   :  { %v512_v26 = vadd.f32 %v510_v25, %v502_v24 }
 0x795   :  { %2761 = vtanh.f32 %v512_v26 }
 0x79f   :  { %v2762_v27 = vpop.eup %2761 }
 0x7a0   :  { %515 = vrot.lane.b32.xlu0 %v2762_v27, %s2913_s3  ;;  %v1053_v27 = vld [vmem:[%s3421_s4 + $0x8] sm:$0xff] }
 0x812   :  { %v516_v28 = vpop.permute.xlu0 %515 }
 0x813   :  { %v518_v29 = vmul.f32 %v516_v28, %v501_v20 }
 0x815   :  { %520 = vrot.lane.b32.xlu1 %v518_v29, %s2914_s11 }
 0x887   :  { %v521_v30 = vpop.permute.xlu1 %520 }
 0x888   :  { %523 = vst.msk [vmem:[#allocation3 + $0x10] sm:$0xff] %vm211_vm6, %v521_v30  ;;  %2443 = vmatmul.mubr.msk.f32.vlgmr.msra.gmra.mrb[8].mxu1 %vm211_vm6, %v521_v30 }
 0x889   :  { %2649 = vmatpush3.bf16.msra.mxu1 %v2987_v6  ;;  %2464 = vmatprep.mubr.msk.f32.mxu1 %vm2911_vm2, %v2912_v14 }
 0x88a   :  { %2650 = vmatprep.subr.bf16.mxu1 %v2910_v8 }
 0x88d   :  { %2652 = vmatpush3.bf16.msra.mxu1 %v3003_v13 }
 0x88e   :  { %2659 = vmatprep.subr.bf16.mxu1 %v2910_v8 }
 0x95b   :  { %v593_v33 = vpop.f32.mrb[8].mxu1 }
 0x95c   :  { %v597_v34 = vadd.f32 %v593_v33, %v175_v32  ;;  %v2444_v35 = vpop.f32.mrb[9].mxu1  ;;  %v1054_v33 = vld [vmem:[%s3421_s4 + $0x10] sm:$0xff] }
 0x95e   :  { %v2233_v36 = vmul.f32 -1.442695, %v597_v34 }
 0x960   :  { %2763 = vpow2.f32 %v2233_v36 }
 0x961   :  { %2765 = vtanh.f32 %v597_v34  ;;  %v1055_v34 = vld [vmem:[%s3421_s4 + $0x18] sm:$0xff] }
 0x962   :  { %v2669_v35 = vpack.c.bf16 %v1055_v34, %v1054_v33 }
 0x96a   :  { %v2764_v37 = vpop.eup %2763 }
 0x96b   :  { %v602_v38 = vadd.f32 1.0, %v2764_v37  ;;  %v2766_v39 = vpop.eup %2765  ;;  %v1044_v37 = vld [vmem:[#allocation3] sm:$0xff] }
 0x96d   :  { %2767 = vrcp.f32 %v602_v38  ;;  %v1045_v38 = vld [vmem:[#allocation3 + $0x8] sm:$0xff] }
 0x977   :  { %v2768_v40 = vpop.eup %2767 }
 0x978   :  { %v605_v41 = vsel %vm3040_vm5, %v2766_v39, %v2768_v40  ;;  %v1046_v39 = vld [vmem:[#allocation3 + $0x10] sm:$0xff] }
 0x979   :  { %608 = vrot.lane.b32.xlu0 %v605_v41, %s2913_s3  ;;  %v606_v44 = vmul.f32 %v605_v41, %v512_v26  ;;  %v1052_v26 = vld [vmem:[%s3421_s4] sm:$0xff] }
 0x97a   :  { %v2665_v28 = vpack.c.bf16 %v1053_v27, %v1052_v26 }
 0x9eb   :  { %v609_v42 = vpop.permute.xlu0 %608 }
 0x9ec   :  { %v611_v43 = vmul.f32 %v609_v42, %v605_v41 }
 0x9ee   :  { %613 = vrot.lane.b32.xlu1 %v611_v43, %s2914_s11  ;;  %v190_v43 = vadd.f32 %v3033_v18, %v3037_v21 }
 0xa60   :  { %v614_v45 = vpop.permute.xlu1 %613 }
 0xa61   :  { %v616_v46 = vadd.f32 %v614_v45, %v606_v44 }
 0xa63   :  { %2769 = vtanh.f32 %v616_v46 }
 0xa6d   :  { %v2770_v47 = vpop.eup %2769 }
 0xa6e   :  { %619 = vrot.lane.b32.xlu0 %v2770_v47, %s2913_s3 }
 0xae0   :  { %v620_v48 = vpop.permute.xlu0 %619 }
 0xae1   :  { %v622_v49 = vmul.f32 %v620_v48, %v605_v41 }
 0xae3   :  { %624 = vrot.lane.b32.xlu1 %v622_v49, %s2914_s11 }
 0xb55   :  { %v625_v50 = vpop.permute.xlu1 %624 }
 0xb56   :  { %627 = vst.msk [vmem:[#allocation3 + $0x18] sm:$0xff] %vm211_vm6, %v625_v50  ;;  %2454 = vmatmul.mubr.msk.f32.vlgmr.msra.gmra.mrb[6].mxu0 %vm211_vm6, %v625_v50 }
 0xb57   :  { %2655 = vmatpush3.bf16.msra.mxu0 %v2987_v6  ;;  %2475 = vmatprep.mubr.msk.f32.mxu0 %vm2911_vm2, %v2912_v14 }
 0xb58   :  { %2656 = vmatprep.subr.bf16.mxu0 %v2910_v8 }
 0xb5b   :  { %2658 = vmatpush3.bf16.msra.mxu0 %v3003_v13 }
 0xb5c   :  { %2666 = vmatprep.subr.bf16.mxu0 %v2665_v28 }
 0xb5d   :  { %v1047_v40 = vld [vmem:[#allocation3 + $0x18] sm:$0xff] }
 0xc29   :  { %v697_v52 = vpop.f32.mrb[6].mxu0 }
 0xc2a   :  { %v701_v53 = vadd.f32 %v697_v52, %v180_v51  ;;  %v2455_v54 = vpop.f32.mrb[7].mxu0 }
 0xc2c   :  { %v2235_v55 = vmul.f32 -1.442695, %v701_v53 }
 0xc2e   :  { %2771 = vpow2.f32 %v2235_v55 }
 0xc2f   :  { %2773 = vtanh.f32 %v701_v53 }
 0xc38   :  { %v2772_v56 = vpop.eup %2771 }
 0xc39   :  { %v706_v57 = vadd.f32 1.0, %v2772_v56  ;;  %v2774_v58 = vpop.eup %2773 }
 0xc3b   :  { %2775 = vrcp.f32 %v706_v57 }
 0xc45   :  { %v2776_v59 = vpop.eup %2775 }
 0xc46   :  { %v709_v60 = vsel %vm3040_vm5, %v2774_v58, %v2776_v59 }
 0xc47   :  { %712 = vrot.lane.b32.xlu0 %v709_v60, %s2913_s3  ;;  %v710_v16 = vmul.f32 %v709_v60, %v616_v46 }
 0xcb9   :  { %v713_v61 = vpop.permute.xlu0 %712 }
 0xcba   :  { %v715_v62 = vmul.f32 %v713_v61, %v709_v60 }
 0xcbc   :  { %717 = vrot.lane.b32.xlu1 %v715_v62, %s2914_s11 }
 0xd2e   :  { %v718_v63 = vpop.permute.xlu1 %717 }
 0xd2f   :  { %v720_v0 = vadd.f32 %v718_v63, %v710_v16  ;;  %v1200_v63 = vld [vmem:[%s3422_s5] sm:$0xff] }
 0xd31   :  { %2777 = vtanh.f32 %v720_v0 }
 0xd3b   :  { %v2778_v1 = vpop.eup %2777 }
 0xd3c   :  { %723 = vrot.lane.b32.xlu0 %v2778_v1, %s2913_s3 }
 0xdae   :  { %v724_v2 = vpop.permute.xlu0 %723 }
 0xdaf   :  { %v726_v3 = vmul.f32 %v724_v2, %v709_v60  ;;  %v1202_v2 = vld [vmem:[%s3422_s5 + $0x10] sm:$0xff] }
 0xdb1   :  { %728 = vrot.lane.b32.xlu1 %v726_v3, %s2914_s11  ;;  %v1203_v3 = vld [vmem:[%s3422_s5 + $0x18] sm:$0xff] }
 0xe23   :  { %v729_v4 = vpop.permute.xlu1 %728 }
 0xe24   :  { %731 = vst.msk [vmem:[#allocation3 + $0x20] sm:$0xff] %vm211_vm6, %v729_v4  ;;  %2465 = vmatmul.mubr.msk.f32.vlgmr.msra.gmra.mrb[10].mxu1 %vm211_vm6, %v729_v4  ;;  %v3193_v4 = vpack.c.bf16 %v1203_v3, %v1202_v2 }
 0xe25   :  { %2661 = vmatpush3.bf16.msra.mxu1 %v2987_v6  ;;  %2486 = vmatprep.mubr.msk.f32.mxu1 %vm2911_vm2, %v2912_v14 }
 0xe26   :  { %2662 = vmatprep.subr.bf16.mxu1 %v2910_v8 }
 0xe29   :  { %2664 = vmatpush3.bf16.msra.mxu1 %v3003_v13 }
 0xe2a   :  { %2673 = vmatprep.subr.bf16.mxu1 %v2910_v8 }
 0xe2b   :  { %v1048_v41 = vld [vmem:[#allocation3 + $0x20] sm:$0xff] }
 0xef7   :  { %v801_v7 = vpop.f32.mrb[10].mxu1 }
 0xef8   :  { %v805_v9 = vadd.f32 %v801_v7, %v185_v5  ;;  %v2466_v10 = vpop.f32.mrb[11].mxu1 }
 0xefa   :  { %v2237_v11 = vmul.f32 -1.442695, %v805_v9 }
 0xefc   :  { %2779 = vpow2.f32 %v2237_v11  ;;  %v195_v11 = vadd.f32 %v3035_v19, %v3033_v18 }
 0xefd   :  { %2781 = vtanh.f32 %v805_v9 }
 0xf06   :  { %v2780_v12 = vpop.eup %2779 }
 0xf07   :  { %v810_v17 = vadd.f32 1.0, %v2780_v12  ;;  %v2782_v6 = vpop.eup %2781 }
 0xf09   :  { %2783 = vrcp.f32 %v810_v17 }
 0xf13   :  { %v2784_v20 = vpop.eup %2783 }
 0xf14   :  { %v813_v22 = vsel %vm3040_vm5, %v2782_v6, %v2784_v20  ;;  %v3219_v20 = vld [vmem:[%s3423_s6] ss:$0 sm:$0xff] }
 0xf15   :  { %816 = vrot.lane.b32.xlu0 %v813_v22, %s2913_s3  ;;  %v814_v15 = vmul.f32 %v813_v22, %v720_v0  ;;  %v1201_v0 = vld [vmem:[%s3422_s5 + $0x8] sm:$0xff] }
 0xf16   :  { %v3183_v1 = vpack.c.bf16 %v1201_v0, %v1200_v63 }
 0xf87   :  { %v817_v13 = vpop.permute.xlu0 %816 }
 0xf88   :  { %v819_v23 = vmul.f32 %v817_v13, %v813_v22 }
 0xf8a   :  { %821 = vrot.lane.b32.xlu1 %v819_v23, %s2914_s11 }
 0xffc   :  { %v822_v24 = vpop.permute.xlu1 %821 }
 0xffd   :  { %v824_v25 = vadd.f32 %v822_v24, %v814_v15 }
 0xfff   :  { %2785 = vtanh.f32 %v824_v25 }
0x1009   :  { %v2786_v29 = vpop.eup %2785 }
0x100a   :  { %827 = vrot.lane.b32.xlu0 %v2786_v29, %s2913_s3 }
0x107c   :  { %v828_v30 = vpop.permute.xlu0 %827 }
0x107d   :  { %v830_v32 = vmul.f32 %v828_v30, %v813_v22 }
0x107f   :  { %832 = vrot.lane.b32.xlu1 %v830_v32, %s2914_s11 }
0x10f1   :  { %v833_v36 = vpop.permute.xlu1 %832 }
0x10f2   :  { %835 = vst.msk [vmem:[#allocation3 + $0x28] sm:$0xff] %vm211_vm6, %v833_v36  ;;  %2476 = vmatmul.mubr.msk.f32.vlgmr.msra.gmra.mrb[8].mxu0 %vm211_vm6, %v833_v36 }
0x10f3   :  { %2668 = vmatpush3.bf16.msra.mxu0 %v2665_v28  ;;  %2497 = vmatprep.mubr.msk.f32.mxu0 %vm211_vm6, %v1044_v37 }
0x10f4   :  { %2670 = vmatprep.subr.bf16.mxu0 %v2669_v35 }
0x10f7   :  { %2672 = vmatpush3.bf16.msra.mxu0 %v2669_v35 }
0x10f8   :  { %2685 = vmatprep.subr.bf16.mxu0 %v2910_v8 }
0x10f9   :  { %v1049_v42 = vld [vmem:[#allocation3 + $0x28] sm:$0xff] }
0x10fa   :  { %2498 = vmatmul.mubr.msk.f32.vlgmr.msra.gmra.mrb[10].mxu0 %vm211_vm6, %v1045_v38 }
0x10fb   :  { %2500 = vmatprep.mubr.msk.f32.mxu0 %vm211_vm6, %v1046_v39  ;;  %2687 = vmatpush3.bf16.msra.mxu0 %v3183_v1 }
0x10fc   :  { %2688 = vmatprep.subr.bf16.mxu0 %v2910_v8 }
0x10fe   :  { %2501 = vmatmul.mubr.msk.f32.gmra.mrb[12].mxu0 %vm211_vm6, %v1047_v40 }
0x10ff   :  { %2503 = vmatprep.mubr.msk.f32.mxu0 %vm211_vm6, %v1048_v41  ;;  %2690 = vmatpush3.bf16.msra.mxu0 %v3193_v4 }
0x1100   :  { %2697 = vmatprep.subr.bf16.mxu0 %v2910_v8 }
0x1102   :  { %2504 = vmatmul.mubr.msk.f32.gmra.mrb[14].mxu0 %vm211_vm6, %v1049_v42 }
0x11c5   :  { %v905_v44 = vpop.f32.mrb[8].mxu0 }
0x11c6   :  { %v909_v45 = vadd.f32 %v905_v44, %v190_v43  ;;  %v2477_v46 = vpop.f32.mrb[9].mxu0 }
0x11c8   :  { %v2239_v47 = vmul.f32 -1.442695, %v909_v45 }
0x11ca   :  { %2787 = vpow2.f32 %v2239_v47 }
0x11cb   :  { %2789 = vtanh.f32 %v909_v45 }
0x11cd   :  { %v3159_v48 = vpop.f32.mrb[10].mxu0 }
0x11ce   :  { %v1153_v49 = vpop.f32.mrb[11].mxu0 }
0x11cf   :  { %v1154_v22 = vadd.f32 %v3219_v20, %v1153_v49 }
0x11d1   :  { %v3161_v50 = vpop.f32.mrb[12].mxu0 }
0x11d2   :  { %v3163_v51 = vpop.f32.mrb[13].mxu0 }
0x11d4   :  { %v2788_v52 = vpop.eup %2787 }
0x11d5   :  { %v914_v53 = vadd.f32 1.0, %v2788_v52  ;;  %v3165_v54 = vpop.f32.mrb[14].mxu0  ;;  %v2790_v21 = vpop.eup %2789 }
0x11d6   :  { %v3167_v55 = vpop.f32.mrb[15].mxu0 }
0x11d7   :  { %2791 = vrcp.f32 %v914_v53 }
0x11e1   :  { %v2792_v56 = vpop.eup %2791 }
0x11e2   :  { %v917_v57 = vsel %vm3040_vm5, %v2790_v21, %v2792_v56  ;;  %v1159_v56 = vadd.f32 %v3159_v48, %v3219_v20 }
0x11e3   :  { %920 = vrot.lane.b32.xlu0 %v917_v57, %s2913_s3  ;;  %v918_v60 = vmul.f32 %v917_v57, %v824_v25 }
0x1255   :  { %v921_v58 = vpop.permute.xlu0 %920 }
0x1256   :  { %v923_v59 = vmul.f32 %v921_v58, %v917_v57 }
0x1258   :  { %925 = vrot.lane.b32.xlu1 %v923_v59, %s2914_s11 }
0x12ca   :  { %v926_v61 = vpop.permute.xlu1 %925 }
0x12cb   :  { %v3173_v62 = vadd.f32 %v926_v61, %v918_v60 }
0x12cd   :  { %2793 = vtanh.f32 %v3173_v62 }
0x12d7   :  { %v2794_v16 = vpop.eup %2793 }
0x12d8   :  { %931 = vrot.lane.b32.xlu0 %v2794_v16, %s2913_s3 }
0x134a   :  { %v932_v5 = vpop.permute.xlu0 %931 }
0x134b   :  { %v934_v7 = vmul.f32 %v932_v5, %v917_v57 }
0x134d   :  { %936 = vrot.lane.b32.xlu1 %v934_v7, %s2914_s11 }
0x13bf   :  { %v937_v9 = vpop.permute.xlu1 %936 }
0x13c0   :  { %939 = vst.msk [vmem:[#allocation3 + $0x30] sm:$0xff] %vm211_vm6, %v937_v9  ;;  %2487 = vmatmul.mubr.msk.f32.vlgmr.msra.gmra.mrb[12].mxu1 %vm211_vm6, %v937_v9 }
0x13c1   :  { %2675 = vmatpush3.bf16.msra.mxu1 %v3183_v1  ;;  %2517 = vmatprep.mubr.msk.f32.mxu1 %vm2911_vm2, %v2912_v14 }
0x13c2   :  { %2676 = vmatprep.subr.bf16.mxu1 %v2910_v8 }
0x13c5   :  { %2678 = vmatpush3.bf16.msra.mxu1 %v3193_v4 }
0x13c6   :  { %2679 = vmatprep.subr.bf16.mxu1 %v2910_v8 }
0x13c7   :  { %v1050_v10 = vld [vmem:[#allocation3 + $0x30] sm:$0xff] }
0x13c8   :  { %2518 = vmatmul.mubr.f32.vlgmr.msra.gmra.mrb[14].mxu1 %v2912_v14  ;;  %2506 = vmatprep.mubr.msk.f32.mxu0 %vm211_vm6, %v1050_v10 }
0x13c9   :  { %2681 = vmatpush3.bf16.msra.mxu1 %v3183_v1  ;;  %2528 = vmatprep.mubr.msk.f32.mxu1 %vm2911_vm2, %v2912_v14 }
0x13ca   :  { %2682 = vmatprep.subr.bf16.mxu1 %v2910_v8 }
0x13cd   :  { %2684 = vmatpush3.bf16.msra.mxu1 %v3193_v4 }
0x13ce   :  { %2691 = vmatprep.subr.bf16.mxu1 %v2910_v8 }
0x1493   :  { %v1009_v12 = vpop.f32.mrb[12].mxu1 }
0x1494   :  { %v1013_v17 = vadd.f32 %v1009_v12, %v195_v11  ;;  %v2488_v6 = vpop.f32.mrb[13].mxu1 }
0x1496   :  { %v2241_v30 = vmul.f32 -1.442695, %v1013_v17 }
0x149b   :  { %v1271_v13 = vpop.f32.mrb[14].mxu1 }
0x149c   :  { %v1275_v23 = vadd.f32 %v1271_v13, %v1154_v22  ;;  %v2519_v15 = vpop.f32.mrb[15].mxu1 }
0x149e   :  { %v2251_v24 = vmul.f32 -1.442695, %v1275_v23 }
0x14a0   :  { %2795 = vpow2.f32 %v2251_v24 }
0x14a1   :  { %2797 = vtanh.f32 %v1275_v23  ;;  %v1164_v23 = vadd.f32 %v3219_v20, %v3163_v51 }
0x14aa   :  { %v2796_v25 = vpop.eup %2795 }
0x14ab   :  { %v1280_v26 = vadd.f32 1.0, %v2796_v25  ;;  %v2798_v18 = vpop.eup %2797 }
0x14ad   :  { %2799 = vrcp.f32 %v1280_v26 }
0x14ae   :  { %2801 = vpow2.f32 %v2241_v30 }
0x14b7   :  { %v2800_v19 = vpop.eup %2799 }
0x14b8   :  { %v1283_v27 = vsel %vm3040_vm5, %v2798_v18, %v2800_v19  ;;  %v2802_v32 = vpop.eup %2801 }
0x14b9   :  { %1286 = vrot.lane.b32.xlu0 %v1283_v27, %s2913_s3  ;;  %v1284_v33 = vmul.f32 0.0, %v1283_v27  ;;  %v1018_v34 = vadd.f32 1.0, %v2802_v32 }
0x152b   :  { %v1287_v28 = vpop.permute.xlu0 %1286 }
0x152c   :  { %v1289_v29 = vmul.f32 %v1287_v28, %v1283_v27 }
0x152e   :  { %1291 = vrot.lane.b32.xlu1 %v1289_v29, %s2914_s11 }
0x15a0   :  { %v1292_v35 = vpop.permute.xlu1 %1291 }
0x15a1   :  { %v1294_v36 = vadd.f32 %v1292_v35, %v1284_v33 }
0x15a3   :  { %2803 = vtanh.f32 %v1294_v36 }
0x15a4   :  { %2805 = vrcp.f32 %v1018_v34 }
0x15a5   :  { %2807 = vtanh.f32 %v1013_v17 }
0x15ad   :  { %v2804_v37 = vpop.eup %2803 }
0x15ae   :  { %v2806_v38 = vpop.eup %2805  ;;  %1297 = vrot.lane.b32.xlu0 %v2804_v37, %s2913_s3 }
0x15af   :  { %v2808_v39 = vpop.eup %2807 }
0x15b0   :  { %v1021_v40 = vsel %vm3040_vm5, %v2808_v39, %v2806_v38  ;;  %v1169_v39 = vadd.f32 %v3161_v50, %v3219_v20 }
0x15b1   :  { %v1022_v46 = vmul.f32 %v1021_v40, %v3173_v62 }
0x15b2   :  { %1024 = vrot.lane.b32.xlu0 %v1021_v40, %s2913_s3 }
0x1620   :  { %v1298_v41 = vpop.permute.xlu0 %1297 }
0x1621   :  { %v3230_v42 = vmul.f32 %v1298_v41, %v1283_v27 }
0x1623   :  { %1309 = vrot.lane.b32.xlu1 %v3230_v42, %s2914_s11 }
0x1624   :  { %v1025_v43 = vpop.permute.xlu0 %1024 }
0x1625   :  { %v1027_v44 = vmul.f32 %v1025_v43, %v1021_v40 }
0x1627   :  { %1029 = vrot.lane.b32.xlu0 %v1027_v44, %s2914_s11 }
0x1695   :  { %v1310_v45 = vpop.permute.xlu1 %1309 }
0x1696   :  { %2529 = vmatmul.mubr.msk.f32.vlgmr.msra.gmra.mrb[16].mxu1 %vm211_vm6, %v1310_v45 }
0x1697   :  { %2693 = vmatpush3.bf16.msra.mxu1 %v3183_v1  ;;  %2550 = vmatprep.mubr.msk.f32.mxu1 %vm2911_vm2, %v2912_v14 }
0x1698   :  { %2694 = vmatprep.subr.bf16.mxu1 %v2910_v8 }
0x1699   :  { %v1030_v47 = vpop.permute.xlu0 %1029 }
0x169a   :  { %v1032_v49 = vadd.f32 %v1030_v47, %v1022_v46 }
0x169b   :  { %2696 = vmatpush3.bf16.msra.mxu1 %v3193_v4 }
0x169c   :  { %2809 = vtanh.f32 %v1032_v49  ;;  %2703 = vmatprep.subr.bf16.mxu1 %v2910_v8 }
0x16a6   :  { %v2810_v52 = vpop.eup %2809 }
0x16a7   :  { %1035 = vrot.lane.b32.xlu0 %v2810_v52, %s2913_s3 }
0x1719   :  { %v1036_v53 = vpop.permute.xlu0 %1035 }
0x171a   :  { %v1038_v21 = vmul.f32 %v1036_v53, %v1021_v40 }
0x171c   :  { %1040 = vrot.lane.b32.xlu0 %v1038_v21, %s2914_s11 }
0x1769   :  { %v1379_v57 = vpop.f32.mrb[16].mxu1 }
0x176a   :  { %v1383_v58 = vadd.f32 %v1379_v57, %v1159_v56  ;;  %v2530_v59 = vpop.f32.mrb[17].mxu1 }
0x176c   :  { %v2253_v60 = vmul.f32 -1.442695, %v1383_v58 }
0x176e   :  { %2811 = vpow2.f32 %v2253_v60 }
0x176f   :  { %2813 = vtanh.f32 %v1383_v58 }
0x1778   :  { %v2812_v61 = vpop.eup %2811 }
0x1779   :  { %v1388_v62 = vadd.f32 1.0, %v2812_v61  ;;  %v2814_v16 = vpop.eup %2813 }
0x177b   :  { %2815 = vrcp.f32 %v1388_v62  ;;  %v1174_v62 = vadd.f32 %v3219_v20, %v3167_v55 }
0x1785   :  { %v2816_v63 = vpop.eup %2815 }
0x1786   :  { %v1391_v0 = vsel %vm3040_vm5, %v2814_v16, %v2816_v63 }
0x1787   :  { %1394 = vrot.lane.b32.xlu1 %v1391_v0, %s2913_s3  ;;  %v1392_v10 = vmul.f32 %v1391_v0, %v1294_v36 }
0x178e   :  { %v1041_v2 = vpop.permute.xlu0 %1040 }
0x178f   :  { %1043 = vst.msk [vmem:[#allocation3 + $0x38] sm:$0xff] %vm211_vm6, %v1041_v2 }
0x1796   :  { %v1051_v48 = vld [vmem:[#allocation3 + $0x38] sm:$0xff] }
0x1797   :  { %2507 = vmatmul.mubr.msk.f32.gmra.mrb[16].mxu0 %vm211_vm6, %v1051_v48 }
0x1798   :  { %2539 = vmatprep.mubr.msk.f32.mxu0 %vm2911_vm2, %v2912_v14 }
0x17f9   :  { %v1395_v3 = vpop.permute.xlu1 %1394 }
0x17fa   :  { %v1397_v5 = vmul.f32 %v1395_v3, %v1391_v0 }
0x17fc   :  { %1399 = vrot.lane.b32.xlu1 %v1397_v5, %s2914_s11 }
0x186a   :  { %v3255_v7 = vpop.f32.mrb[16].mxu0 }
0x186b   :  { %v3257_v9 = vpop.f32.mrb[17].mxu0 }
0x186e   :  { %v1400_v11 = vpop.permute.xlu1 %1399 }
0x186f   :  { %v1402_v12 = vadd.f32 %v1400_v11, %v1392_v10 }
0x1871   :  { %2817 = vtanh.f32 %v1402_v12 }
0x187b   :  { %v2818_v17 = vpop.eup %2817 }
0x187c   :  { %1405 = vrot.lane.b32.xlu1 %v2818_v17, %s2913_s3 }
0x18ee   :  { %v1406_v6 = vpop.permute.xlu1 %1405 }
0x18ef   :  { %v3260_v22 = vmul.f32 %v1406_v6, %v1391_v0 }
0x18f1   :  { %1417 = vrot.lane.b32.xlu1 %v3260_v22, %s2914_s11 }
0x1963   :  { %v1418_v13 = vpop.permute.xlu1 %1417 }
0x1964   :  { %2540 = vmatmul.mubr.msk.f32.vlgmr.msra.gmra.mrb[18].mxu0 %vm211_vm6, %v1418_v13 }
0x1965   :  { %2699 = vmatpush3.bf16.msra.mxu0 %v3183_v1  ;;  %2561 = vmatprep.mubr.msk.f32.mxu0 %vm2911_vm2, %v2912_v14 }
0x1966   :  { %2700 = vmatprep.subr.bf16.mxu0 %v2910_v8 }
0x1969   :  { %2702 = vmatpush3.bf16.msra.mxu0 %v3193_v4 }
0x196a   :  { %2709 = vmatprep.subr.bf16.mxu0 %v2910_v8 }
0x1a37   :  { %v1487_v15 = vpop.f32.mrb[18].mxu0 }
0x1a38   :  { %v1491_v24 = vadd.f32 %v1487_v15, %v1164_v23  ;;  %v2541_v25 = vpop.f32.mrb[19].mxu0 }
0x1a3a   :  { %v2255_v26 = vmul.f32 -1.442695, %v1491_v24 }
0x1a3c   :  { %2819 = vpow2.f32 %v2255_v26  ;;  %v1179_v26 = vadd.f32 %v3165_v54, %v3219_v20 }
0x1a3d   :  { %2821 = vtanh.f32 %v1491_v24 }
0x1a46   :  { %v2820_v18 = vpop.eup %2819 }
0x1a47   :  { %v1496_v19 = vadd.f32 1.0, %v2820_v18  ;;  %v2822_v27 = vpop.eup %2821 }
0x1a49   :  { %2823 = vrcp.f32 %v1496_v19 }
0x1a53   :  { %v2824_v28 = vpop.eup %2823 }
0x1a54   :  { %v1499_v29 = vsel %vm3040_vm5, %v2822_v27, %v2824_v28 }
0x1a55   :  { %1502 = vrot.lane.b32.xlu0 %v1499_v29, %s2913_s3  ;;  %v1500_v51 = vmul.f32 %v1499_v29, %v1402_v12 }
0x1ac7   :  { %v1503_v30 = vpop.permute.xlu0 %1502 }
0x1ac8   :  { %v1505_v32 = vmul.f32 %v1503_v30, %v1499_v29 }
0x1aca   :  { %1507 = vrot.lane.b32.xlu1 %v1505_v32, %s2914_s11 }
0x1b3c   :  { %v1508_v33 = vpop.permute.xlu1 %1507 }
0x1b3d   :  { %v1510_v34 = vadd.f32 %v1508_v33, %v1500_v51 }
0x1b3f   :  { %2825 = vtanh.f32 %v1510_v34 }
0x1b49   :  { %v2826_v35 = vpop.eup %2825 }
0x1b4a   :  { %1513 = vrot.lane.b32.xlu0 %v2826_v35, %s2913_s3 }
0x1bbc   :  { %v1514_v36 = vpop.permute.xlu0 %1513 }
0x1bbd   :  { %v3278_v37 = vmul.f32 %v1514_v36, %v1499_v29 }
0x1bbf   :  { %1525 = vrot.lane.b32.xlu1 %v3278_v37, %s2914_s11 }
0x1c31   :  { %v1526_v38 = vpop.permute.xlu1 %1525 }
0x1c32   :  { %2551 = vmatmul.mubr.msk.f32.vlgmr.msra.gmra.mrb[18].mxu1 %vm211_vm6, %v1526_v38 }
0x1c33   :  { %2705 = vmatpush3.bf16.msra.mxu1 %v3183_v1  ;;  %2572 = vmatprep.mubr.msk.f32.mxu1 %vm2911_vm2, %v2912_v14 }
0x1c34   :  { %2706 = vmatprep.subr.bf16.mxu1 %v2910_v8 }
0x1c37   :  { %2708 = vmatpush3.bf16.msra.mxu1 %v3193_v4 }
0x1c38   :  { %2715 = vmatprep.subr.bf16.mxu1 %v2910_v8 }
0x1d05   :  { %v1595_v40 = vpop.f32.mrb[18].mxu1 }
0x1d06   :  { %v1599_v41 = vadd.f32 %v1595_v40, %v1169_v39  ;;  %v2552_v43 = vpop.f32.mrb[19].mxu1  ;;  %v1184_v39 = vadd.f32 %v3219_v20, %v3257_v9 }
0x1d08   :  { %v2257_v44 = vmul.f32 -1.442695, %v1599_v41 }
0x1d0a   :  { %2827 = vpow2.f32 %v2257_v44 }
0x1d0b   :  { %2829 = vtanh.f32 %v1599_v41 }
0x1d14   :  { %v2828_v45 = vpop.eup %2827 }
0x1d15   :  { %v1604_v46 = vadd.f32 1.0, %v2828_v45  ;;  %v2830_v47 = vpop.eup %2829 }
0x1d17   :  { %2831 = vrcp.f32 %v1604_v46 }
0x1d21   :  { %v2832_v49 = vpop.eup %2831 }
0x1d22   :  { %v1607_v52 = vsel %vm3040_vm5, %v2830_v47, %v2832_v49 }
0x1d23   :  { %1610 = vrot.lane.b32.xlu0 %v1607_v52, %s2913_s3  ;;  %v1608_v50 = vmul.f32 %v1607_v52, %v1510_v34 }
0x1d95   :  { %v1611_v53 = vpop.permute.xlu0 %1610 }
0x1d96   :  { %v1613_v21 = vmul.f32 %v1611_v53, %v1607_v52 }
0x1d98   :  { %1615 = vrot.lane.b32.xlu1 %v1613_v21, %s2914_s11 }
0x1e0a   :  { %v1616_v56 = vpop.permute.xlu1 %1615 }
0x1e0b   :  { %v1618_v57 = vadd.f32 %v1616_v56, %v1608_v50 }
0x1e0d   :  { %2833 = vtanh.f32 %v1618_v57 }
0x1e17   :  { %v2834_v58 = vpop.eup %2833 }
0x1e18   :  { %1621 = vrot.lane.b32.xlu0 %v2834_v58, %s2913_s3 }
0x1e8a   :  { %v1622_v59 = vpop.permute.xlu0 %1621 }
0x1e8b   :  { %v3296_v60 = vmul.f32 %v1622_v59, %v1607_v52 }
0x1e8d   :  { %1633 = vrot.lane.b32.xlu1 %v3296_v60, %s2914_s11 }
0x1eff   :  { %v1634_v61 = vpop.permute.xlu1 %1633 }
0x1f00   :  { %2562 = vmatmul.mubr.msk.f32.vlgmr.msra.gmra.mrb[20].mxu0 %vm211_vm6, %v1634_v61 }
0x1f01   :  { %2711 = vmatpush3.bf16.msra.mxu0 %v3183_v1  ;;  %2583 = vmatprep.mubr.msk.f32.mxu0 %vm2911_vm2, %v2912_v14 }
0x1f02   :  { %2712 = vmatprep.subr.bf16.mxu0 %v2910_v8 }
0x1f05   :  { %2714 = vmatpush3.bf16.msra.mxu0 %v3193_v4 }
0x1fd3   :  { %v1703_v16 = vpop.f32.mrb[20].mxu0 }
0x1fd4   :  { %v1707_v63 = vadd.f32 %v1703_v16, %v1174_v62  ;;  %v2563_v0 = vpop.f32.mrb[21].mxu0  ;;  %v1189_v62 = vadd.f32 %v3255_v7, %v3219_v20 }
0x1fd6   :  { %v2259_v2 = vmul.f32 -1.442695, %v1707_v63 }
0x1fd8   :  { %2835 = vpow2.f32 %v2259_v2 }
0x1fd9   :  { %2837 = vtanh.f32 %v1707_v63 }
0x1fe2   :  { %v2836_v48 = vpop.eup %2835 }
0x1fe3   :  { %v1712_v3 = vadd.f32 1.0, %v2836_v48  ;;  %v2838_v5 = vpop.eup %2837 }
0x1fe5   :  { %2839 = vrcp.f32 %v1712_v3 }
0x1fef   :  { %v2840_v10 = vpop.eup %2839 }
0x1ff0   :  { %v1715_v11 = vsel %vm3040_vm5, %v2838_v5, %v2840_v10 }
0x1ff1   :  { %1718 = vrot.lane.b32.xlu0 %v1715_v11, %s2913_s3  ;;  %v1716_v55 = vmul.f32 %v1715_v11, %v1618_v57 }
0x2063   :  { %v1719_v12 = vpop.permute.xlu0 %1718 }
0x2064   :  { %v1721_v17 = vmul.f32 %v1719_v12, %v1715_v11 }
0x2066   :  { %1723 = vrot.lane.b32.xlu1 %v1721_v17, %s2914_s11 }
0x20d8   :  { %v1724_v6 = vpop.permute.xlu1 %1723 }
0x20d9   :  { %v1726_v13 = vadd.f32 %v1724_v6, %v1716_v55 }
0x20db   :  { %2841 = vtanh.f32 %v1726_v13 }
0x20e5   :  { %v2842_v23 = vpop.eup %2841 }
0x20e6   :  { %1729 = vrot.lane.b32.xlu0 %v2842_v23, %s2913_s3  ;;  %v2072_v23 = vld [vmem:[%s3424_s7 + $0x8] sm:$0xff] }
0x2158   :  { %v1730_v15 = vpop.permute.xlu0 %1729 }
0x2159   :  { %v3313_v24 = vmul.f32 %v1730_v15, %v1715_v11 }
0x215b   :  { %1741 = vrot.lane.b32.xlu1 %v3313_v24, %s2914_s11 }
0x21cd   :  { %v1742_v25 = vpop.permute.xlu1 %1741 }
0x21ce   :  { %2573 = vmatmul.mubr.msk.f32.vlgmr.msra.gmra.mrb[20].mxu1 %vm211_vm6, %v1742_v25  ;;  %v2073_v25 = vld [vmem:[%s3424_s7 + $0x10] sm:$0xff] }
0x21cf   :  { %2717 = vmatpush3.bf16.msra.mxu1 %v3183_v1  ;;  %2594 = vmatprep.mubr.msk.f32.mxu1 %vm2911_vm2, %v2912_v14 }
0x21d0   :  { %2718 = vmatprep.subr.bf16.mxu1 %v2910_v8 }
0x21d3   :  { %2720 = vmatpush3.bf16.msra.mxu1 %v3193_v4 }
0x22a1   :  { %v1811_v18 = vpop.f32.mrb[20].mxu1 }
0x22a2   :  { %v1815_v19 = vadd.f32 %v1811_v18, %v1179_v26  ;;  %v2574_v27 = vpop.f32.mrb[21].mxu1  ;;  %v2074_v26 = vld [vmem:[%s3424_s7 + $0x18] sm:$0xff] }
0x22a3   :  { %v2725_v18 = vpack.c.bf16 %v2074_v26, %v2073_v25 }
0x22a4   :  { %v2261_v28 = vmul.f32 -1.442695, %v1815_v19 }
0x22a6   :  { %2843 = vpow2.f32 %v2261_v28 }
0x22a7   :  { %2845 = vtanh.f32 %v1815_v19 }
0x22b0   :  { %v2844_v29 = vpop.eup %2843 }
0x22b1   :  { %v1820_v30 = vadd.f32 1.0, %v2844_v29  ;;  %v2846_v1 = vpop.eup %2845 }
0x22b3   :  { %2847 = vrcp.f32 %v1820_v30 }
0x22bd   :  { %v2848_v32 = vpop.eup %2847 }
0x22be   :  { %v1823_v14 = vsel %vm3040_vm5, %v2846_v1, %v2848_v32 }
0x22bf   :  { %1826 = vrot.lane.b32.xlu0 %v1823_v14, %s2913_s3  ;;  %v1824_v54 = vmul.f32 %v1823_v14, %v1726_v13  ;;  %v2071_v13 = vld [vmem:[%s3424_s7] sm:$0xff] }
0x22c0   :  { %v2721_v15 = vpack.c.bf16 %v2072_v23, %v2071_v13 }
0x22c2   :  { %2722 = vmatprep.subr.bf16.mxu0 %v2721_v15 }
0x2331   :  { %v1827_v8 = vpop.permute.xlu0 %1826 }
0x2332   :  { %v1829_v4 = vmul.f32 %v1827_v8, %v1823_v14 }
0x2334   :  { %1831 = vrot.lane.b32.xlu1 %v1829_v4, %s2914_s11 }
0x23a6   :  { %v1832_v51 = vpop.permute.xlu1 %1831 }
0x23a7   :  { %v1834_v33 = vadd.f32 %v1832_v51, %v1824_v54 }
0x23a9   :  { %2849 = vtanh.f32 %v1834_v33 }
0x23b3   :  { %v2850_v34 = vpop.eup %2849 }
0x23b4   :  { %1837 = vrot.lane.b32.xlu0 %v2850_v34, %s2913_s3 }
0x2426   :  { %v1838_v35 = vpop.permute.xlu0 %1837 }
0x2427   :  { %v3330_v36 = vmul.f32 %v1838_v35, %v1823_v14 }
0x2429   :  { %1849 = vrot.lane.b32.xlu1 %v3330_v36, %s2914_s11 }
0x249b   :  { %v1850_v38 = vpop.permute.xlu1 %1849 }
0x249c   :  { %2584 = vmatmul.mubr.msk.f32.vlgmr.msra.gmra.mrb[22].mxu0 %vm211_vm6, %v1850_v38 }
0x249d   :  { %2724 = vmatpush3.bf16.msra.mxu0 %v2721_v15 }
0x249e   :  { %2726 = vmatprep.subr.bf16.mxu0 %v2725_v18 }
0x24a1   :  { %2728 = vmatpush3.bf16.msra.mxu0 %v2725_v18 }
0x256f   :  { %v1919_v40 = vpop.f32.mrb[22].mxu0 }
0x2570   :  { %v1923_v41 = vadd.f32 %v1919_v40, %v1184_v39  ;;  %v2585_v43 = vpop.f32.mrb[23].mxu0 }
0x2572   :  { %v2263_v44 = vmul.f32 -1.442695, %v1923_v41 }
0x2574   :  { %2851 = vpow2.f32 %v2263_v44 }
0x2575   :  { %2853 = vtanh.f32 %v1923_v41 }
0x257e   :  { %v2852_v45 = vpop.eup %2851 }
0x257f   :  { %v1928_v46 = vadd.f32 1.0, %v2852_v45  ;;  %v2854_v47 = vpop.eup %2853 }
0x2581   :  { %2855 = vrcp.f32 %v1928_v46 }
0x258b   :  { %v2856_v49 = vpop.eup %2855 }
0x258c   :  { %v1931_v52 = vsel %vm3040_vm5, %v2854_v47, %v2856_v49 }
0x258d   :  { %1934 = vrot.lane.b32.xlu0 %v1931_v52, %s2913_s3  ;;  %v1932_v9 = vmul.f32 %v1931_v52, %v1834_v33 }
0x25ff   :  { %v1935_v53 = vpop.permute.xlu0 %1934 }
0x2600   :  { %v1937_v21 = vmul.f32 %v1935_v53, %v1931_v52 }
0x2602   :  { %1939 = vrot.lane.b32.xlu1 %v1937_v21, %s2914_s11 }
0x2674   :  { %v1940_v50 = vpop.permute.xlu1 %1939 }
0x2675   :  { %v1942_v56 = vadd.f32 %v1940_v50, %v1932_v9 }
0x2677   :  { %2857 = vtanh.f32 %v1942_v56 }
0x2681   :  { %v2858_v57 = vpop.eup %2857 }
0x2682   :  { %1945 = vrot.lane.b32.xlu0 %v2858_v57, %s2913_s3 }
0x26f4   :  { %v1946_v58 = vpop.permute.xlu0 %1945 }
0x26f5   :  { %v1948_v59 = vmul.f32 %v1946_v58, %v1931_v52 }
0x26f7   :  { %1957 = vrot.lane.b32.xlu1 %v1948_v59, %s2914_s11 }
0x2769   :  { %v1958_v61 = vpop.permute.xlu1 %1957 }
0x276a   :  { %2595 = vmatmul.mubr.msk.f32.vlgmr.msra.gmra.mrb[22].mxu1 %vm211_vm6, %v1958_v61 }
0x283d   :  { %v2027_v16 = vpop.f32.mrb[22].mxu1 }
0x283e   :  { %v2031_v63 = vadd.f32 %v2027_v16, %v1189_v62  ;;  %v2596_v0 = vpop.f32.mrb[23].mxu1 }
0x2840   :  { %v2265_v2 = vmul.f32 -1.442695, %v2031_v63 }
0x2842   :  { %2859 = vpow2.f32 %v2265_v2 }
0x2843   :  { %2861 = vtanh.f32 %v2031_v63 }
0x284c   :  { %v2860_v48 = vpop.eup %2859 }
0x284d   :  { %v2036_v3 = vadd.f32 1.0, %v2860_v48  ;;  %v2862_v5 = vpop.eup %2861 }
0x284f   :  { %2863 = vrcp.f32 %v2036_v3 }
0x2850   :  { %2865 = vtanh.f32 %v3230_v42 }
0x2851   :  { %2867 = vtanh.f32 %v3278_v37 }
0x2852   :  { %2869 = vtanh.f32 %v3313_v24 }
0x2853   :  { %2871 = vtanh.f32 %v1948_v59 }
0x2859   :  { %v2864_v10 = vpop.eup %2863 }
0x285a   :  { %v2039_v11 = vsel %vm3040_vm5, %v2862_v5, %v2864_v10  ;;  %v2866_v12 = vpop.eup %2865 }
0x285b   :  { %2042 = vrot.lane.b32.xlu0 %v2039_v11, %s2913_s3  ;;  %v2868_v17 = vpop.eup %2867  ;;  %v2040_v42 = vmul.f32 %v2039_v11, %v1942_v56 }
0x285c   :  { %v2870_v31 = vpop.eup %2869 }
0x285d   :  { %v2872_v55 = vpop.eup %2871 }
0x28cd   :  { %v2043_v20 = vpop.permute.xlu0 %2042 }
0x28ce   :  { %v2045_v7 = vmul.f32 %v2043_v20, %v2039_v11 }
0x28d0   :  { %2047 = vrot.lane.b32.xlu1 %v2045_v7, %s2914_s11 }
0x28d4   :  { %1303 = vrot.lane.b32.xlu1 %v2866_v12, %s2914_s11 }
0x28d8   :  { %1519 = vrot.lane.b32.xlu1 %v2868_v17, %s2914_s11 }
0x28dc   :  { %1735 = vrot.lane.b32.xlu1 %v2870_v31, %s2914_s11 }
0x28e0   :  { %1951 = vrot.lane.b32.xlu1 %v2872_v55, %s2914_s11 }
0x2942   :  { %v2048_v37 = vpop.permute.xlu1 %2047 }
0x2943   :  { %v2050_v6 = vadd.f32 %v2048_v37, %v2040_v42 }
0x2945   :  { %2873 = vtanh.f32 %v2050_v6 }
0x2946   :  { %v1304_v24 = vpop.permute.xlu1 %1303  ;;  %2875 = vtanh.f32 %v3260_v22 }
0x2947   :  { %1306 = vst.msk [vmem:[#allocation3] sm:$0xff] %vm211_vm6, %v1304_v24  ;;  %2877 = vtanh.f32 %v3296_v60 }
0x2948   :  { %2879 = vtanh.f32 %v3330_v36 }
0x294a   :  { %v1520_v19 = vpop.permute.xlu1 %1519 }
0x294b   :  { %1522 = vst.msk [vmem:[#allocation3 + $0x10] sm:$0xff] %vm211_vm6, %v1520_v19 }
0x294e   :  { %v1736_v27 = vpop.permute.xlu1 %1735  ;;  %v2063_v28 = vld [vmem:[#allocation3] sm:$0xff] }
0x294f   :  { %v2874_v29 = vpop.eup %2873  ;;  %1738 = vst.msk [vmem:[#allocation3 + $0x20] sm:$0xff] %vm211_vm6, %v1736_v27  ;;  %2605 = vmatprep.mubr.msk.f32.mxu0 %vm211_vm6, %v2063_v28 }
0x2950   :  { %2053 = vrot.lane.b32.xlu0 %v2874_v29, %s2913_s3  ;;  %v2876_v30 = vpop.eup %2875 }
0x2951   :  { %v2878_v1 = vpop.eup %2877 }
0x2952   :  { %v1952_v22 = vpop.permute.xlu1 %1951  ;;  %v2880_v60 = vpop.eup %2879  ;;  %v2065_v34 = vld [vmem:[#allocation3 + $0x10] sm:$0xff] }
0x2953   :  { %1954 = vst.msk [vmem:[#allocation3 + $0x30] sm:$0xff] %vm211_vm6, %v1952_v22 }
0x2954   :  { %1411 = vrot.lane.b32.xlu0 %v2876_v30, %s2914_s11 }
0x2956   :  { %v2067_v36 = vld [vmem:[#allocation3 + $0x20] sm:$0xff] }
0x2958   :  { %1627 = vrot.lane.b32.xlu0 %v2878_v1, %s2914_s11 }
0x295a   :  { %v2069_v39 = vld [vmem:[#allocation3 + $0x30] sm:$0xff] }
0x295c   :  { %1843 = vrot.lane.b32.xlu0 %v2880_v60, %s2914_s11 }
0x29c2   :  { %v2054_v32 = vpop.permute.xlu0 %2053 }
0x29c3   :  { %v2056_v14 = vmul.f32 %v2054_v32, %v2039_v11 }
0x29c5   :  { %2881 = vtanh.f32 %v2056_v14 }
0x29c6   :  { %v1412_v8 = vpop.permute.xlu0 %1411 }
0x29c7   :  { %1414 = vst.msk [vmem:[#allocation3 + $0x8] sm:$0xff] %vm211_vm6, %v1412_v8 }
0x29ca   :  { %v1628_v4 = vpop.permute.xlu0 %1627 }
0x29cb   :  { %1630 = vst.msk [vmem:[#allocation3 + $0x18] sm:$0xff] %vm211_vm6, %v1628_v4 }
0x29ce   :  { %v1844_v54 = vpop.permute.xlu0 %1843  ;;  %v2064_v51 = vld [vmem:[#allocation3 + $0x8] sm:$0xff] }
0x29cf   :  { %v2882_v33 = vpop.eup %2881  ;;  %1846 = vst.msk [vmem:[#allocation3 + $0x28] sm:$0xff] %vm211_vm6, %v1844_v54  ;;  %2606 = vmatmul.mubr.msk.f32.vlgmr.msra.gmra.mrb[24].mxu0 %vm211_vm6, %v2064_v51 }
0x29d0   :  { %2059 = vrot.lane.b32.xlu0 %v2882_v33, %s2914_s11  ;;  %2608 = vmatprep.mubr.msk.f32.mxu0 %vm211_vm6, %v2065_v34 }
0x29d2   :  { %v2066_v35 = vld [vmem:[#allocation3 + $0x18] sm:$0xff] }
0x29d3   :  { %2609 = vmatmul.mubr.msk.f32.gmra.mrb[26].mxu0 %vm211_vm6, %v2066_v35 }
0x29d4   :  { %2611 = vmatprep.mubr.msk.f32.mxu0 %vm211_vm6, %v2067_v36 }
0x29d6   :  { %v2068_v38 = vld [vmem:[#allocation3 + $0x28] sm:$0xff] }
0x29d7   :  { %2612 = vmatmul.mubr.msk.f32.gmra.mrb[28].mxu0 %vm211_vm6, %v2068_v38 }
0x29d8   :  { %2614 = vmatprep.mubr.msk.f32.mxu0 %vm211_vm6, %v2069_v39 }
0x2a42   :  { %v2060_v40 = vpop.permute.xlu0 %2059 }
0x2a43   :  { %2062 = vst.msk [vmem:[#allocation3 + $0x38] sm:$0xff] %vm211_vm6, %v2060_v40 }
0x2a4a   :  { %v2070_v41 = vld [vmem:[#allocation3 + $0x38] sm:$0xff] }
0x2a4b   :  { %2615 = vmatmul.mubr.msk.f32.gmra.mrb[30].mxu0 %vm211_vm6, %v2070_v41 }
0x2aa2   :  { %v2607_v43 = vpop.f32.mrb[24].mxu0 }
0x2aa3   :  { %2205 = vst [vmem:[%s3425_s8 + $0x8] sm:$0xff] %v2607_v43  ;;  %v2165_v44 = vpop.f32.mrb[25].mxu0 }
0x2aa4   :  { %2204 = vst [vmem:[%s3425_s8] sm:$0xff] %v2165_v44 }
0x2aa6   :  { %v2610_v45 = vpop.f32.mrb[26].mxu0 }
0x2aa7   :  { %2207 = vst [vmem:[%s3425_s8 + $0x18] sm:$0xff] %v2610_v45  ;;  %v2175_v46 = vpop.f32.mrb[27].mxu0 }
0x2aa8   :  { %2206 = vst [vmem:[%s3425_s8 + $0x10] sm:$0xff] %v2175_v46 }
0x2aaa   :  { %v2613_v47 = vpop.f32.mrb[28].mxu0 }
0x2aab   :  { %2209 = vst [vmem:[%s3425_s8 + $0x28] sm:$0xff] %v2613_v47  ;;  %v2185_v49 = vpop.f32.mrb[29].mxu0 }
0x2aac   :  { %2208 = vst [vmem:[%s3425_s8 + $0x20] sm:$0xff] %v2185_v49 }
0x2b1e   :  { %v2616_v52 = vpop.f32.mrb[30].mxu0 }
0x2b1f   :  { %2211 = vst [vmem:[%s3425_s8 + $0x38] sm:$0xff] %v2616_v52  ;;  %v2195_v53 = vpop.f32.mrb[31].mxu0 }
0x2b20   :  { %2210 = vst [vmem:[%s3425_s8 + $0x30] sm:$0xff] %v2195_v53 }
0x2b21   :  { %2216 = vsyncpa [#allocation5], 1 }

</bundles_post_ra>
